<compile_context>
chip_gen: v5e
topology: v5e:2x2
jax: 0.10.0
libtpu: 0.0.40
codegen_flags: <defaults>
</compile_context>

<pallas_src>
import functools

import jax
import jax.numpy as jnp
from jax import lax
from jax.experimental import pallas as pl
from jax.experimental.pallas import tpu as pltpu


# ----------------------------------------------------------------------------
# Kernel 1: QKV projection, head-major output, Q pre-scaled.
# grid = (B, H, N // block_n)
# ----------------------------------------------------------------------------
def qkv_proj_kernel(x_ref, wq_ref, wk_ref, wv_ref, bq_ref, bk_ref, bv_ref,
                    q_ref, k_ref, v_ref, *, scale):
    x = x_ref[0]                                        # (tn, C)
    q = jnp.dot(x, wq_ref[0], preferred_element_type=jnp.float32) + bq_ref[0]
    k = jnp.dot(x, wk_ref[0], preferred_element_type=jnp.float32) + bk_ref[0]
    v = jnp.dot(x, wv_ref[0], preferred_element_type=jnp.float32) + bv_ref[0]
    q_ref[0, 0] = (q * scale).astype(q_ref.dtype)       # fold `* scale` here, once
    k_ref[0, 0] = k.astype(k_ref.dtype)
    v_ref[0, 0] = v.astype(v_ref.dtype)


# ----------------------------------------------------------------------------
# Kernel 2: flash attention with online softmax.
# grid = (B, H, N // block_q, N // block_kv)   (kv axis last, "arbitrary")
# ----------------------------------------------------------------------------
def flash_attention_kernel(q_ref, k_ref, v_ref, o_ref, m_sc, l_sc, acc_sc):
    j = pl.program_id(3)

    @pl.when(j == 0)
    def _():
        m_sc[...] = jnp.full_like(m_sc, -jnp.inf)
        l_sc[...] = jnp.zeros_like(l_sc)
        acc_sc[...] = jnp.zeros_like(acc_sc)

    q = q_ref[0, 0]                                     # (tq, D), already scaled
    k = k_ref[0, 0]                                     # (tk, D)
    v = v_ref[0, 0]                                     # (tk, D)

    # Scores: contract last dims directly — no explicit K transpose.
    s = lax.dot_general(q, k, (((1,), (1,)), ((), ())),
                        preferred_element_type=jnp.float32)          # (tq, tk)

    m_prev = m_sc[...]
    m_new = jnp.maximum(m_prev, jnp.max(s, axis=-1, keepdims=True))  # (tq, 1)
    alpha = jnp.exp(m_prev - m_new)
    p = jnp.exp(s - m_new)                                           # f32 softmax math
    l_sc[...] = alpha * l_sc[...] + jnp.sum(p, axis=-1, keepdims=True)
    acc_sc[...] = alpha * acc_sc[...] + jnp.dot(
        p.astype(v.dtype), v, preferred_element_type=jnp.float32)
    m_sc[...] = m_new

    @pl.when(j == pl.num_programs(3) - 1)
    def _():
        inv_l = pl.reciprocal(l_sc[...], approx=True)   # EUP, normalize once
        o_ref[0, 0] = (acc_sc[...] * inv_l).astype(o_ref.dtype)


# ----------------------------------------------------------------------------
# Kernel 3: output projection, reducing over heads (== transpose(1,2).reshape
#           followed by out_proj, without ever materializing the (N, C) concat).
# grid = (B, N // block_n, H)   (head axis last, "arbitrary")
# ----------------------------------------------------------------------------
def out_proj_kernel(ctx_ref, wout_ref, bout_ref, o_ref, acc_sc):
    h = pl.program_id(2)

    @pl.when(h == 0)
    def _():
        acc_sc[...] = jnp.zeros_like(acc_sc)

    acc_sc[...] += jnp.dot(ctx_ref[0, 0], wout_ref[0],
                           preferred_element_type=jnp.float32)

    @pl.when(h == pl.num_programs(2) - 1)
    def _():
        o_ref[0] = (acc_sc[...] + bout_ref[...]).astype(o_ref.dtype)


# ----------------------------------------------------------------------------
# Wrapper
# ----------------------------------------------------------------------------
def attention_forward(x, wqkv, bqkv, wout, bout, *, num_heads,
                      block_q=128, block_kv=128, block_n=128):
    B, N, C = x.shape
    H = num_heads
    D = C // H
    scale = D ** (-0.5)

    block_q = min(block_q, N)
    block_kv = min(block_kv, N)
    block_n = min(block_n, N)
    assert N % block_q == 0 and N % block_kv == 0 and N % block_n == 0, \
        "sequence length must be divisible by the tile sizes"
    assert block_q % 8 == 0 and block_kv % 8 == 0 and block_n % 8 == 0

    # Head-major weight / bias views (column layout of Wqkv is [3, H, D]).
    wq = wqkv[:, 0 * C:1 * C].reshape(C, H, D).transpose(1, 0, 2)   # (H, C, D)
    wk = wqkv[:, 1 * C:2 * C].reshape(C, H, D).transpose(1, 0, 2)
    wv = wqkv[:, 2 * C:3 * C].reshape(C, H, D).transpose(1, 0, 2)
    bq = bqkv[0 * C:1 * C].reshape(H, 1, D)
    bk = bqkv[1 * C:2 * C].reshape(H, 1, D)
    bv = bqkv[2 * C:3 * C].reshape(H, 1, D)
    wout_r = wout.reshape(H, D, C)                                  # (H, D, C)
    bout_r = bout.reshape(1, C)

    # ---- 1) QKV projection, head-major, q pre-scaled ----
    q, k, v = pl.pallas_call(
        functools.partial(qkv_proj_kernel, scale=scale),
        out_shape=[jax.ShapeDtypeStruct((B, H, N, D), x.dtype) for _ in range(3)],
        grid=(B, H, N // block_n),
        in_specs=[
            pl.BlockSpec((1, block_n, C), lambda b, h, i: (b, i, 0)),   # x
            pl.BlockSpec((1, C, D), lambda b, h, i: (h, 0, 0)),         # Wq[h]
            pl.BlockSpec((1, C, D), lambda b, h, i: (h, 0, 0)),         # Wk[h]
            pl.BlockSpec((1, C, D), lambda b, h, i: (h, 0, 0)),         # Wv[h]
            pl.BlockSpec((1, 1, D), lambda b, h, i: (h, 0, 0)),         # bq[h]
            pl.BlockSpec((1, 1, D), lambda b, h, i: (h, 0, 0)),         # bk[h]
            pl.BlockSpec((1, 1, D), lambda b, h, i: (h, 0, 0)),         # bv[h]
        ],
        out_specs=[
            pl.BlockSpec((1, 1, block_n, D), lambda b, h, i: (b, h, i, 0))
            for _ in range(3)
        ],
        compiler_params=pltpu.CompilerParams(
            dimension_semantics=("parallel", "parallel", "parallel")),
    )(x, wq, wk, wv, bq, bk, bv)

    # ---- 2) flash attention (online softmax over kv tiles) ----
    ctx = pl.pallas_call(
        flash_attention_kernel,
        out_shape=jax.ShapeDtypeStruct((B, H, N, D), x.dtype),
        grid=(B, H, N // block_q, N // block_kv),
        in_specs=[
            pl.BlockSpec((1, 1, block_q, D), lambda b, h, i, j: (b, h, i, 0)),
            pl.BlockSpec((1, 1, block_kv, D), lambda b, h, i, j: (b, h, j, 0)),
            pl.BlockSpec((1, 1, block_kv, D), lambda b, h, i, j: (b, h, j, 0)),
        ],
        out_specs=pl.BlockSpec((1, 1, block_q, D), lambda b, h, i, j: (b, h, i, 0)),
        scratch_shapes=[
            pltpu.VMEM((block_q, 1), jnp.float32),   # running max
            pltpu.VMEM((block_q, 1), jnp.float32),   # running sum
            pltpu.VMEM((block_q, D), jnp.float32),   # accumulator
        ],
        compiler_params=pltpu.CompilerParams(
            dimension_semantics=("parallel", "parallel", "parallel", "arbitrary")),
    )(q, k, v)

    # ---- 3) output projection, reducing over heads ----
    out = pl.pallas_call(
        out_proj_kernel,
        out_shape=jax.ShapeDtypeStruct((B, N, C), x.dtype),
        grid=(B, N // block_n, H),
        in_specs=[
            pl.BlockSpec((1, 1, block_n, D), lambda b, i, h: (b, h, i, 0)),  # ctx
            pl.BlockSpec((1, D, C), lambda b, i, h: (h, 0, 0)),              # Wout[h]
            pl.BlockSpec((1, C), lambda b, i, h: (0, 0)),                    # bout
        ],
        out_specs=pl.BlockSpec((1, block_n, C), lambda b, i, h: (b, i, 0)),
        scratch_shapes=[pltpu.VMEM((block_n, C), jnp.float32)],
        compiler_params=pltpu.CompilerParams(
            dimension_semantics=("parallel", "parallel", "arbitrary")),
    )(ctx, wout_r, bout_r)

    return out


def attention_reference(x, wqkv, bqkv, wout, bout, *, num_heads):
    """Pure-JAX reference mirroring the PyTorch forward exactly."""
    B, N, C = x.shape
    D = C // num_heads
    scale = D ** (-0.5)
    qkv = x @ wqkv + bqkv                                    # (B, N, 3C)
    qkv = qkv.reshape(B, N, 3, num_heads, D).transpose(2, 0, 3, 1, 4)
    q, k, v = qkv[0], qkv[1], qkv[2]                         # (B, H, N, D)
    q = q * scale
    attn = jnp.einsum("bhnd,bhmd->bhnm", q, k)
    attn = jax.nn.softmax(attn, axis=-1)
    o = jnp.einsum("bhnm,bhmd->bhnd", attn, v)               # (B, H, N, D)
    o = o.transpose(0, 2, 1, 3).reshape(B, N, C)
    return o @ wout + bout


if __name__ == "__main__":
    # Small but lane-dense shapes: D = 128, C multiple of 128, N gives 2 kv tiles
    # so the online-softmax accumulation path is actually exercised.
    B, N, num_heads, head_dim = 2, 256, 2, 128
    C = num_heads * head_dim                                  # 256

    key = jax.random.PRNGKey(0)
    k_x, k_wq, k_bq, k_wo, k_bo = jax.random.split(key, 5)

    x = jax.random.normal(k_x, (B, N, C), dtype=jnp.float32)
    # Deterministic synthetic parameters, (in, out) layout.
    wqkv = jax.random.normal(k_wq, (C, 3 * C), dtype=jnp.float32) * 0.05
    bqkv = jax.random.normal(k_bq, (3 * C,), dtype=jnp.float32) * 0.05
    wout = jax.random.normal(k_wo, (C, C), dtype=jnp.float32) * 0.05
    bout = jax.random.normal(k_bo, (C,), dtype=jnp.float32) * 0.05

    out = attention_forward(x, wqkv, bqkv, wout, bout, num_heads=num_heads)
    out = jax.block_until_ready(out)

    ref = attention_reference(x, wqkv, bqkv, wout, bout, num_heads=num_heads)
    assert out.shape == (B, N, C)
    max_err = float(jnp.max(jnp.abs(out - ref)))
    # Tolerance accounts for approx (EUP) reciprocal in the softmax finalize.
    assert jnp.allclose(out, ref, atol=2e-2, rtol=2e-2), \
        f"mismatch vs reference, max abs err = {max_err}"

    print("KERNEL_OK")
</pallas_src>

<mosaic_0001>
module attributes {stable_mosaic.version = 11 : i64} {
  func.func @qkv_proj_kernel(%arg0: i32, %arg1: i32, %arg2: i32, %arg3: memref<1x128x256xf32, #tpu.memory_space<vmem>>, %arg4: memref<1x256x128xf32, #tpu.memory_space<vmem>>, %arg5: memref<1x256x128xf32, #tpu.memory_space<vmem>>, %arg6: memref<1x256x128xf32, #tpu.memory_space<vmem>>, %arg7: memref<1x1x128xf32, #tpu.memory_space<vmem>>, %arg8: memref<1x1x128xf32, #tpu.memory_space<vmem>>, %arg9: memref<1x1x128xf32, #tpu.memory_space<vmem>>, %arg10: memref<1x1x128x128xf32, #tpu.memory_space<vmem>>, %arg11: memref<1x1x128x128xf32, #tpu.memory_space<vmem>>, %arg12: memref<1x1x128x128xf32, #tpu.memory_space<vmem>>) attributes {dimension_semantics = [#tpu.dimension_semantics<parallel>, #tpu.dimension_semantics<parallel>, #tpu.dimension_semantics<parallel>], iteration_bounds = array<i64: 2, 2, 2>, scalar_prefetch = 0 : i64, scratch_operands = 0 : i64, tpu.core_type = #tpu.core_type<tc>, window_params = [{transform_indices = @transform_0, window_bounds = array<i64: 1, 128, 256>}, {transform_indices = @transform_1, window_bounds = array<i64: 1, 256, 128>}, {transform_indices = @transform_2, window_bounds = array<i64: 1, 256, 128>}, {transform_indices = @transform_3, window_bounds = array<i64: 1, 256, 128>}, {transform_indices = @transform_4, window_bounds = array<i64: 1, 1, 128>}, {transform_indices = @transform_5, window_bounds = array<i64: 1, 1, 128>}, {transform_indices = @transform_6, window_bounds = array<i64: 1, 1, 128>}, {transform_indices = @transform_7, window_bounds = array<i64: 1, 1, 128, 128>}, {transform_indices = @transform_8, window_bounds = array<i64: 1, 1, 128, 128>}, {transform_indices = @transform_9, window_bounds = array<i64: 1, 1, 128, 128>}]} {
    %c0 = arith.constant 0 : index
    %c0_0 = arith.constant 0 : index
    %c0_1 = arith.constant 0 : index
    %0 = vector.load %arg3[%c0, %c0_0, %c0_1] : memref<1x128x256xf32, #tpu.memory_space<vmem>>, vector<1x128x256xf32>
    %1 = vector.shape_cast %0 : vector<1x128x256xf32> to vector<128x256xf32>
    %c0_2 = arith.constant 0 : index
    %c0_3 = arith.constant 0 : index
    %c0_4 = arith.constant 0 : index
    %2 = vector.load %arg4[%c0_2, %c0_3, %c0_4] : memref<1x256x128xf32, #tpu.memory_space<vmem>>, vector<1x256x128xf32>
    %3 = vector.shape_cast %2 : vector<1x256x128xf32> to vector<256x128xf32>
    %cst = arith.constant dense<0.000000e+00> : vector<128x128xf32>
    %4 = tpu.matmul %1, %3, %cst {dimension_numbers = #tpu.dot_dimension_numbers<[1], [0], [0], [1], [0, 0, 1, 1], [], []>} : vector<128x256xf32>, vector<256x128xf32>, vector<128x128xf32> -> vector<128x128xf32>
    %c0_5 = arith.constant 0 : index
    %c0_6 = arith.constant 0 : index
    %c0_7 = arith.constant 0 : index
    %5 = vector.load %arg7[%c0_5, %c0_6, %c0_7] : memref<1x1x128xf32, #tpu.memory_space<vmem>>, vector<1x1x128xf32>
    %6 = vector.shape_cast %5 : vector<1x1x128xf32> to vector<1x128xf32>
    %7 = vector.broadcast %6 : vector<1x128xf32> to vector<128x128xf32>
    %8 = arith.addf %4, %7 : vector<128x128xf32>
    %c0_8 = arith.constant 0 : index
    %c0_9 = arith.constant 0 : index
    %c0_10 = arith.constant 0 : index
    %9 = vector.load %arg5[%c0_8, %c0_9, %c0_10] : memref<1x256x128xf32, #tpu.memory_space<vmem>>, vector<1x256x128xf32>
    %10 = vector.shape_cast %9 : vector<1x256x128xf32> to vector<256x128xf32>
    %cst_11 = arith.constant dense<0.000000e+00> : vector<128x128xf32>
    %11 = tpu.matmul %1, %10, %cst_11 {dimension_numbers = #tpu.dot_dimension_numbers<[1], [0], [0], [1], [0, 0, 1, 1], [], []>} : vector<128x256xf32>, vector<256x128xf32>, vector<128x128xf32> -> vector<128x128xf32>
    %c0_12 = arith.constant 0 : index
    %c0_13 = arith.constant 0 : index
    %c0_14 = arith.constant 0 : index
    %12 = vector.load %arg8[%c0_12, %c0_13, %c0_14] : memref<1x1x128xf32, #tpu.memory_space<vmem>>, vector<1x1x128xf32>
    %13 = vector.shape_cast %12 : vector<1x1x128xf32> to vector<1x128xf32>
    %14 = vector.broadcast %13 : vector<1x128xf32> to vector<128x128xf32>
    %15 = arith.addf %11, %14 : vector<128x128xf32>
    %c0_15 = arith.constant 0 : index
    %c0_16 = arith.constant 0 : index
    %c0_17 = arith.constant 0 : index
    %16 = vector.load %arg6[%c0_15, %c0_16, %c0_17] : memref<1x256x128xf32, #tpu.memory_space<vmem>>, vector<1x256x128xf32>
    %17 = vector.shape_cast %16 : vector<1x256x128xf32> to vector<256x128xf32>
    %cst_18 = arith.constant dense<0.000000e+00> : vector<128x128xf32>
    %18 = tpu.matmul %1, %17, %cst_18 {dimension_numbers = #tpu.dot_dimension_numbers<[1], [0], [0], [1], [0, 0, 1, 1], [], []>} : vector<128x256xf32>, vector<256x128xf32>, vector<128x128xf32> -> vector<128x128xf32>
    %c0_19 = arith.constant 0 : index
    %c0_20 = arith.constant 0 : index
    %c0_21 = arith.constant 0 : index
    %19 = vector.load %arg9[%c0_19, %c0_20, %c0_21] : memref<1x1x128xf32, #tpu.memory_space<vmem>>, vector<1x1x128xf32>
    %20 = vector.shape_cast %19 : vector<1x1x128xf32> to vector<1x128xf32>
    %21 = vector.broadcast %20 : vector<1x128xf32> to vector<128x128xf32>
    %22 = arith.addf %18, %21 : vector<128x128xf32>
    %cst_22 = arith.constant 0.0883883461 : f32
    %23 = vector.broadcast %cst_22 : f32 to vector<128x128xf32>
    %24 = arith.mulf %8, %23 : vector<128x128xf32>
    %c0_23 = arith.constant 0 : index
    %c0_24 = arith.constant 0 : index
    %c0_25 = arith.constant 0 : index
    %c0_26 = arith.constant 0 : index
    %25 = vector.load %arg10[%c0_23, %c0_24, %c0_25, %c0_26] : memref<1x1x128x128xf32, #tpu.memory_space<vmem>>, vector<1x1x128x128xf32>
    %26 = vector.shape_cast %25 : vector<1x1x128x128xf32> to vector<128x128xf32>
    %27 = vector.shape_cast %24 : vector<128x128xf32> to vector<1x1x128x128xf32>
    tpu.vector_store %arg10[%c0_23, %c0_24, %c0_25, %c0_26], %27 {strides = array<i32>} : memref<1x1x128x128xf32, #tpu.memory_space<vmem>>, vector<1x1x128x128xf32>,
    %c0_27 = arith.constant 0 : index
    %c0_28 = arith.constant 0 : index
    %c0_29 = arith.constant 0 : index
    %c0_30 = arith.constant 0 : index
    %28 = vector.load %arg11[%c0_27, %c0_28, %c0_29, %c0_30] : memref<1x1x128x128xf32, #tpu.memory_space<vmem>>, vector<1x1x128x128xf32>
    %29 = vector.shape_cast %28 : vector<1x1x128x128xf32> to vector<128x128xf32>
    %30 = vector.shape_cast %15 : vector<128x128xf32> to vector<1x1x128x128xf32>
    tpu.vector_store %arg11[%c0_27, %c0_28, %c0_29, %c0_30], %30 {strides = array<i32>} : memref<1x1x128x128xf32, #tpu.memory_space<vmem>>, vector<1x1x128x128xf32>,
    %c0_31 = arith.constant 0 : index
    %c0_32 = arith.constant 0 : index
    %c0_33 = arith.constant 0 : index
    %c0_34 = arith.constant 0 : index
    %31 = vector.load %arg12[%c0_31, %c0_32, %c0_33, %c0_34] : memref<1x1x128x128xf32, #tpu.memory_space<vmem>>, vector<1x1x128x128xf32>
    %32 = vector.shape_cast %31 : vector<1x1x128x128xf32> to vector<128x128xf32>
    %33 = vector.shape_cast %22 : vector<128x128xf32> to vector<1x1x128x128xf32>
    tpu.vector_store %arg12[%c0_31, %c0_32, %c0_33, %c0_34], %33 {strides = array<i32>} : memref<1x1x128x128xf32, #tpu.memory_space<vmem>>, vector<1x1x128x128xf32>,
    return
  }
  func.func @transform_0(%arg0: i32, %arg1: i32, %arg2: i32) -> (i32, i32, i32) {
    %c0_i32 = arith.constant 0 : i32
    %c0_i32_0 = arith.constant 0 : i32
    return %arg0, %arg2, %c0_i32 : i32, i32, i32
  }
  func.func @transform_1(%arg0: i32, %arg1: i32, %arg2: i32) -> (i32, i32, i32) {
    %c0_i32 = arith.constant 0 : i32
    %c0_i32_0 = arith.constant 0 : i32
    %c0_i32_1 = arith.constant 0 : i32
    return %arg1, %c0_i32, %c0_i32_0 : i32, i32, i32
  }
  func.func @transform_2(%arg0: i32, %arg1: i32, %arg2: i32) -> (i32, i32, i32) {
    %c0_i32 = arith.constant 0 : i32
    %c0_i32_0 = arith.constant 0 : i32
    %c0_i32_1 = arith.constant 0 : i32
    return %arg1, %c0_i32, %c0_i32_0 : i32, i32, i32
  }
  func.func @transform_3(%arg0: i32, %arg1: i32, %arg2: i32) -> (i32, i32, i32) {
    %c0_i32 = arith.constant 0 : i32
    %c0_i32_0 = arith.constant 0 : i32
    %c0_i32_1 = arith.constant 0 : i32
    return %arg1, %c0_i32, %c0_i32_0 : i32, i32, i32
  }
  func.func @transform_4(%arg0: i32, %arg1: i32, %arg2: i32) -> (i32, i32, i32) {
    %c0_i32 = arith.constant 0 : i32
    %c0_i32_0 = arith.constant 0 : i32
    %c0_i32_1 = arith.constant 0 : i32
    return %arg1, %c0_i32, %c0_i32_0 : i32, i32, i32
  }
  func.func @transform_5(%arg0: i32, %arg1: i32, %arg2: i32) -> (i32, i32, i32) {
    %c0_i32 = arith.constant 0 : i32
    %c0_i32_0 = arith.constant 0 : i32
    %c0_i32_1 = arith.constant 0 : i32
    return %arg1, %c0_i32, %c0_i32_0 : i32, i32, i32
  }
  func.func @transform_6(%arg0: i32, %arg1: i32, %arg2: i32) -> (i32, i32, i32) {
    %c0_i32 = arith.constant 0 : i32
    %c0_i32_0 = arith.constant 0 : i32
    %c0_i32_1 = arith.constant 0 : i32
    return %arg1, %c0_i32, %c0_i32_0 : i32, i32, i32
  }
  func.func @transform_7(%arg0: i32, %arg1: i32, %arg2: i32) -> (i32, i32, i32, i32) {
    %c0_i32 = arith.constant 0 : i32
    %c0_i32_0 = arith.constant 0 : i32
    return %arg0, %arg1, %arg2, %c0_i32 : i32, i32, i32, i32
  }
  func.func @transform_8(%arg0: i32, %arg1: i32, %arg2: i32) -> (i32, i32, i32, i32) {
    %c0_i32 = arith.constant 0 : i32
    %c0_i32_0 = arith.constant 0 : i32
    return %arg0, %arg1, %arg2, %c0_i32 : i32, i32, i32, i32
  }
  func.func @transform_9(%arg0: i32, %arg1: i32, %arg2: i32) -> (i32, i32, i32, i32) {
    %c0_i32 = arith.constant 0 : i32
    %c0_i32_0 = arith.constant 0 : i32
    return %arg0, %arg1, %arg2, %c0_i32 : i32, i32, i32, i32
  }
}

</mosaic_0001>

<bundles_post_ra>
// kernel: tpu_custom_call.1
= control target key start
LH: loop header
LB: loop body
LE: loop exit
PB: predicated region body
PF: predicated region fallthrough
CT: control target
= control target key end

     0   :  { %s3037_s0 = inlined_call_operand.hbm [shape: f32[2,256,256], index: 0, kind: input, shape index: {}]   ;;  %s3038_s1 = inlined_call_operand.hbm [shape: f32[2,256,128], index: 1, kind: input, shape index: {}]   ;;  %s3039_s2 = inlined_call_operand.hbm [shape: f32[2,256,128], index: 2, kind: input, shape index: {}]   ;;  %s3040_s3 = inlined_call_operand.hbm [shape: f32[2,256,128], index: 3, kind: input, shape index: {}]   ;;  %s3041_s4 = inlined_call_operand.vmem [shape: f32[2,1,128], index: 4, kind: input, shape index: {}]   ;;  %s3042_s5 = inlined_call_operand.vmem [shape: f32[2,1,128], index: 5, kind: input, shape index: {}]   ;;  %s3043_s6 = inlined_call_operand.hbm [shape: f32[2,1,128], index: 6, kind: input, shape index: {}]   ;;  %s3044_s7 = inlined_call_operand.hbm [shape: f32[2,2,256,128], index: 7, kind: output, shape index: {0}]   ;;  %s3045_s8 = inlined_call_operand.hbm [shape: f32[2,2,256,128], index: 8, kind: output, shape index: {1}]   ;;  %s3046_s9 = inlined_call_operand.hbm [shape: f32[2,2,256,128], index: 9, kind: output, shape index: {2}]  }
   0x1   :  { %3072 = sst [smem:[#allocation39_spill]] %s3037_s0 }
   0x2   :  { %3073 = sst [smem:[#allocation40_spill]] %s3038_s1 }
   0x3   :  { %3074 = sst [smem:[#allocation41_spill]] %s3039_s2 }
   0x4   :  { %3075 = sst [smem:[#allocation42_spill]] %s3040_s3 }
   0x5   :  { %3076 = sst [smem:[#allocation43_spill]] %s3041_s4 }
   0x6   :  { %3077 = sst [smem:[#allocation44_spill]] %s3042_s5 }
   0x7   :  { %3078 = sst [smem:[#allocation45_spill]] %s3043_s6 }
   0x8   :  { %3079 = sst [smem:[#allocation46_spill]] %s3044_s7 }
   0x9   :  { %3080 = sst [smem:[#allocation47_spill]] %s3045_s8 }
   0xa   :  { %3081 = sst [smem:[#allocation48_spill]] %s3046_s9 }
   0xb   :  { %15 = vsyncpa [#allocation3], 0 }
   0xc   :  { %17 = vsyncpa [#allocation3 + $0x1], 0 }
   0xd   :  { %18 = vsyncpa [#allocation6], 0 }
   0xe   :  { %20 = vsyncpa [#allocation6 + $0x1], 0 }
   0xf   :  { %21 = vsyncpa [#allocation9], 0 }
  0x10   :  { %23 = vsyncpa [#allocation9 + $0x1], 0 }
  0x11   :  { %24 = vsyncpa [#allocation4], 0 }
  0x12   :  { %26 = vsyncpa [#allocation4 + $0x1], 0 }
  0x13   :  { %27 = vsyncpa [#allocation13], 0 }
  0x14   :  { %29 = vsyncpa [#allocation13 + $0x1], 0  ;;  %s2229_s30 = smov 0   ;;  %s2231_s10 = smov 0  }
  0x15   :  { %s2233_s11 = smov 0   ;;  %s2235_s12 = smov 0  }
  0x16   :  { %s2237_s13 = smov 0   ;;  %s2239_s14 = smov 0  }
  0x17   :  { %s2241_s15 = smov 0   ;;  %s2243_s16 = smov 0  }
  0x18   :  { %s2245_s17 = smov 0   ;;  %s2247_s18 = smov 0  }
  0x19   :  { %s2249_s19 = smov 0   ;;  %s2251_s20 = smov 0  }
  0x1a   :  { %s2253_s21 = smov 0   ;;  %s2255_s22 = smov 0  }
  0x1b   :  { %s2257_s23 = smov 0   ;;  %s2259_s24 = smov 0  }
  0x1c LB: > { %3082 = sst [smem:[#allocation20_spill]] %s2119_s11  ;;  %p71_p0 = scmp.eq.s32.totalorder %s2171_s24, 0  ;;  %s2171_s24 = sphi %s2259_s24, %s35_s24   ;;  %s2167_s23 = sphi %s2257_s23, %s3146_s23   ;;  %s2163_s22 = sphi %s2255_s22, %s3152_s22   ;;  %s2159_s21 = sphi %s2253_s21, %s3144_s21   ;;  %s2155_s20 = sphi %s2251_s20, %s3143_s20   ;;  %s2151_s19 = sphi %s2249_s19, %s3151_s19   ;;  %s2147_s18 = sphi %s2247_s18, %s3142_s18   ;;  %s2143_s17 = sphi %s2245_s17, %s3141_s17   ;;  %s2139_s16 = sphi %s2243_s16, %s3140_s16   ;;  %s2135_s15 = sphi %s2241_s15, %s3139_s15   ;;  %s2131_s14 = sphi %s2239_s14, %s3150_s14   ;;  %s2127_s13 = sphi %s2237_s13, %s3149_s13   ;;  %s2123_s12 = sphi %s2235_s12, %s3137_s12   ;;  %s2119_s11 = sphi %s2233_s11, %s3136_s11   ;;  %s2115_s10 = sphi %s2231_s10, %s3148_s10   ;;  %s2111_s30 = sphi %s2229_s30, %s3147_s30  }
  0x1d   : > { %3083 = sst [smem:[#allocation21_spill]] %s2127_s13  ;;  %p96_p1 = scmp.ne.s32.totalorder %s2131_s14, %s2127_s13 }
  0x1e   : > { %3084 = sst [smem:[#allocation22_spill]] %s2139_s16  ;;  %p102_p2 = scmp.ne.s32.totalorder %s2127_s13, %s2123_s12 }
  0x1f   : > { %3085 = sst [smem:[#allocation23_spill]] %s2143_s17  ;;  %p1652_p3 = scmp.lt.s32.totalorder %s2171_s24, 8 }
  0x20   : > { %3086 = sst [smem:[#allocation24_spill]] %s2147_s18  ;;  %p98_p4 = por %p96_p1, %p71_p0 }
  0x21   : > { %3087 = sst [smem:[#allocation25_spill]] %s2151_s19  ;;  %s371_s26 = sand.u32 1, %s2171_s24  }
  0x22   : > { %3088 = sst [smem:[#allocation26_spill]] %s2155_s20  ;;  %s3051_s27 = sand.u32 1, %s2131_s14  }
  0x23   : > { %3089 = sst [smem:[#allocation27_spill]] %s2159_s21  ;;  %s2322_s28 = sshll.u32 %s3051_s27, 8 }
  0x24   : > { %3090 = sst [smem:[#allocation28_spill]] %s2167_s23  ;;  %s2325_s29 = sshll.u32 %s2163_s22, 8 }
  0x25   : > { %s3091_s1 = sld [smem:[#allocation40_spill]]  ;;  %s375_s20 = scalar_lea.vmem [#allocation5], %s2322_s28 }
  0x26   : > { %s383_s18 = sshll.u32 %s375_s20, 4  ;;  %p2334_p5 = pnand %p1652_p3, %p98_p4  ;;  %s384_s18 = int_to_ptr.vmem [resolvable:$true] %s383_s18 }
  0x27   : > { %p1549_p6 = scmp.ge.s32.totalorder %s2171_s24, 1  ;;  %p464_p7 = scmp.lt.s32.totalorder %s2171_s24, 9 }
  0x28   : > { %s2340_s8 = scalar_lea.sflag [#allocation6], %s371_s26  ;;  %s3054_s9 = smov 128  }
  0x29   : > { %s3055_s20 = smov 8   ;;  %p2348_p8 = pnand %p1549_p6, %p464_p7 }
  0x2a   : > { %s3095_s3 = sld [smem:[#allocation42_spill]]  ;;  %s419_s6 = scalar_lea.vmem [#allocation8], %s2322_s28 }
  0x2b   : > { %s380_s25 = scalar_lea.hbm %s3091_s1, %s2325_s29  ;;  %s427_s2 = sshll.u32 %s419_s6, 4  ;;  %s428_s2 = int_to_ptr.vmem [resolvable:$true] %s427_s2 }
  0x2c   : > { %s381_s7 = sshll.u32 %s380_s25, 4  ;;  %s2366_s1 = sadd.s32 4294967295, %s2171_s24   ;;  %s382_s7 = int_to_ptr.hbm [resolvable:$true] %s381_s7 }
  0x2d   : > { %1632 = dma.hbm_to_vmem [thread:$0]  (!%p2334_p5), %s382_s7, 4096, %s384_s18, %s2340_s8, %s3054_s9, %s3054_s9, %s3055_s20  }
  0x2e   : > { %s3093_s25 = scalar_select %p2348_p8, 1, 0 }
  0x2f   : > { %s2357_s7 = scalar_lea.sflag [#allocation9], %s371_s26  ;;  %s47_s6 = sadd.s32 1, %s2159_s21 }
  0x30   : > { %3094 = sst [smem:[#allocation29_spill]] %s3093_s25  ;;  %s424_s4 = scalar_lea.hbm %s3095_s3, %s2325_s29 }
  0x31   : > { %s425_s19 = sshll.u32 %s424_s4, 4  ;;  %s50_s18 = sadd.s32 1, %s2163_s22  ;;  %s426_s19 = int_to_ptr.hbm [resolvable:$true] %s425_s19 }
  0x32   : > { %1638 = dma.hbm_to_vmem [thread:$0]  (!%p2334_p5), %s426_s19, 4096, %s428_s2, %s2357_s7, %s3054_s9, %s3054_s9, %s3055_s20  }
  0x33   : > { %p48_p9 = scmp.ge.s32.totalorder %s47_s6, 2  ;;  %s54_s27 = sadd.s32 1, %s2167_s23 }
  0x34   : > { %s63_s3 = sadd.s32 1, %s2143_s17  ;;  %p70_p10 = scmp.ne.s32.totalorder %s2143_s17, %s2139_s16 }
  0x35   : > { %s3154_s6 = smov (%p48_p9, %s47_s6), 0  ;;  %s3156_s18 = smov (!%p48_p9, %s50_s18), %s2163_s22 }
  0x36   : > { %3096 = sst [smem:[#allocation30_spill]] %s3154_s6  ;;  %s59_s2 = ssub.s32 %s2159_s21, %s3154_s6 }
  0x37   : > { %p2382_p11 = por %p71_p0, %p70_p10  ;;  %p52_p12 = scmp.ge.s32.totalorder %s3156_s18, 2 }
  0x38   : > { %p76_p13 = scmp.ne.s32.totalorder %s2139_s16, %s2135_s15  ;;  %p77_p1 = scmp.eq.s32.totalorder %s2366_s1, 0 }
  0x39   : > { %s249_s26 = sadd.s32 1, %s2119_s11  ;;  %s3158_s18 = smov (%p52_p12, %s3156_s18), 0 }
  0x3a   : > { %3098 = sst [smem:[#allocation31_spill]] %s3158_s18  ;;  %s3160_s27 = smov (!%p52_p12, %s54_s27), %s2167_s23 }
  0x3b   : > { %p2393_p4 = por %p77_p1, %p76_p13  ;;  %s86_s20 = ssub.s32 %s2163_s22, %s3158_s18 }
  0x3c   : > { %p56_p0 = scmp.ge.s32.totalorder %s3160_s27, 2  ;;  %p87_p6 = scmp.eq.s32.totalorder %s86_s20, 0 }
  0x3d   : > { %s3099_s9 = scalar_select %p2393_p4, 1, 0 }
  0x3e   : > { %p2402_p7 = por %p102_p2, %p77_p1  ;;  %p259_p9 = scmp.ne.s32.totalorder %s2119_s11, %s2115_s10 }
  0x3f   : > { %3100 = sst [smem:[#allocation32_spill]] %s3099_s9  ;;  %s3162_s27 = smov (%p56_p0, %s3160_s27), 0 }
  0x40   : > { %s3101_s15 = scalar_select %p2402_p7, 1, 0 }
  0x41   : > { %3103 = sst [smem:[#allocation34_spill]] %s3162_s27  ;;  %s3104_s4 = sadd.s32 1, %s2131_s14 }
  0x42   : > { %3102 = sst [smem:[#allocation33_spill]] %s3101_s15  ;;  %s58_s18 = ssub.s32 %s2167_s23, %s3162_s27 }
  0x43   : > { %s2413_s6 = scalar_select %p87_p6, %s2131_s14, %s3104_s4  }
  0x44   : > { %p260_p10 = scmp.eq.s32.totalorder %s2366_s1, 7  ;;  %s60_s9 = sor.u32 %s59_s2, %s58_s18 }
  0x45   : > { %3105 = sst [smem:[#allocation35_spill]] %s2413_s6  ;;  %s244_s16 = sor.u32 %s86_s20, %s58_s18 }
  0x46   : > { %p61_p12 = scmp.eq.s32.totalorder %s60_s9, 0  ;;  %s246_s12 = sor.u32 %s244_s16, %s59_s2 }
  0x47   : > { %p247_p2 = scmp.eq.s32.totalorder %s246_s12, 0  ;;  %p2418_p13 = por %p260_p10, %p259_p9 }
  0x48   : > { %s2423_s15 = scalar_select %p61_p12, %s2143_s17, %s63_s3  }
  0x49   : > { %s2426_s25 = scalar_select %p247_p2, %s2119_s11, %s249_s26  }
  0x4a   : > { %3107 = sst [smem:[#allocation36_spill]] %s2423_s15  ;;  %p265_p1 = scmp.ne.s32.totalorder %s2115_s10, %s2111_s30 }
  0x4b   : > { %3108 = sst [smem:[#allocation37_spill]] %s2426_s25  ;;  %s3109_s4 = sadd.s32 4294967294, %s2171_s24  }
  0x4c   : > { %p266_p0 = scmp.eq.s32.totalorder %s3109_s4, 7  ;;  %s346_s27 = sand.u32 1, %s2143_s17  }
  0x4d   : > { %s1574_s6 = sshll.u32 %s2159_s21, 5  ;;  %s1535_s16 = sshll.u32 %s346_s27, 8 }
  0x4e   : > { %p2434_p6 = por %p266_p0, %p265_p1  ;;  %s1538_s9 = sshll.u32 %s2167_s23, 6 }
  0x4f   : > { %s356_s18 = sadd.s32 %s1574_s6, %s1538_s9  ;;  %s350_s2 = scalar_lea.vmem [#allocation2], %s1535_s16 }
  0x50   : > { %s3110_s20 = scalar_select %p2434_p6, 1, 0 }
  0x51   : > { %s1539_s3 = sshll.u32 %s356_s18, 3  ;;  %s361_s12 = sshll.u32 %s350_s2, 4  ;;  %s362_s12 = int_to_ptr.vmem [resolvable:$true] %s361_s12 }
  0x52   : > { %3111 = sst [smem:[#allocation38_spill]] %s3110_s20  ;;  %p1627_p9 = pnand %p1652_p3, %p2382_p11 }
  0x53   : > { %s3112_s0 = sld [smem:[#allocation39_spill]]  ;;  %s347_s23 = scalar_lea.sflag [#allocation3], %s346_s27 }
  0x54   : > { %s2175_s17 = smov 256   ;;  %s2176_s6 = smov 16  }
  0x55   : > { %s3113_s15 = sld [smem:[#allocation41_spill]]  ;;  %s3114_s19 = smov 8  }
  0x56   : > { %s3116_s25 = sld [smem:[#allocation45_spill]] }
  0x59   : > { %s358_s4 = scalar_lea.hbm %s3112_s0, %s1539_s3  ;;  %s397_s3 = scalar_lea.vmem [#allocation7], %s2322_s28 }
  0x5a   : > { %s359_s21 = sshll.u32 %s358_s4, 4  ;;  %s405_s26 = sshll.u32 %s397_s3, 4  ;;  %s360_s21 = int_to_ptr.hbm [resolvable:$true] %s359_s21  ;;  %s406_s26 = int_to_ptr.vmem [resolvable:$true] %s405_s26 }
  0x5b   : > { %1629 = dma.hbm_to_vmem [thread:$0]  (!%p1627_p9), %s360_s21, 4096, %s362_s12, %s347_s23, %s2175_s17, %s2175_s17, %s2176_s6  }
  0x5c   : > { %s402_s18 = scalar_lea.hbm %s3113_s15, %s2325_s29  ;;  %s3115_s4 = smov 128  }
  0x5d   : > { %s403_s2 = sshll.u32 %s402_s18, 4  ;;  %s455_s11 = scalar_lea.hbm %s3116_s25, %s2163_s22  ;;  %s404_s2 = int_to_ptr.hbm [resolvable:$true] %s403_s2 }
  0x5e   : > { %1635 = dma.hbm_to_vmem [thread:$0]  (!%p2334_p5), %s404_s2, 4096, %s406_s26, %s2340_s8, %s3115_s4, %s3115_s4, %s3114_s19  }
  0x5f   : > { %s457_s20 = sshll.u32 %s455_s11, 4  ;;  %s3117_s17 = sand.u32 1, %s2131_s14   ;;  %s458_s20 = int_to_ptr.hbm [resolvable:$true] %s457_s20 }
  0x60   : > { %s452_s21 = scalar_lea.vmem [#allocation10], %s3117_s17  ;;  %468 = sbr.rel (%p2348_p8) target bundleno = 487 (0x1e7), region = 48 }
  0x61   : > { %s459_s23 = sshll.u32 %s452_s21, 4  ;;  %s3119_s29 = sld [smem:[#allocation22_spill]] (!%p2348_p8)  ;;  %s460_s23 = int_to_ptr.vmem [resolvable:$true] %s459_s23 }
  0x62   : > { %1641 = dma.hbm_to_vmem [thread:$0]  (!%p2334_p5), %s458_s20, 16, %s460_s23, %s2357_s7  }
  0x67   : > { %s470_s6 = sand.u32 1, %s3119_s29  }
  0x68   : > { %s1550_s16 = sshll.u32 %s470_s6, 8  ;;  %s471_s8 = scalar_lea.sflag [#allocation3], %s470_s6 }
  0x69   : > { %s2469_s9 = scalar_lea.vmem [#allocation2], %s1550_s16 }
  0x6a   : > { %2090 = dma.done.wait (%p2393_p4), %s471_s8, 4096  }
  0x6b   : > { %2092 = vsyncadd (%p2393_p4), %s471_s8, 4294963200  ;;  %s3121_s0 = sld [smem:[#allocation21_spill]]  ;;  %s2476_s11 = sand.u32 1, %s2366_s1  }
  0x6c   : > { %s481_s20 = scalar_lea.sflag [#allocation6], %s2476_s11 }
  0x71   : > { %s482_s25 = sand.u32 1, %s3121_s0  }
  0x72   : > { %s1551_s7 = sshll.u32 %s482_s25, 8 }
  0x73   : > { %s2482_s15 = scalar_lea.vmem [#allocation5], %s1551_s7 }
  0x74   : > { %2094 = dma.done.wait (%p2402_p7), %s481_s20, 8192  }
  0x75   : > { %2096 = vsyncadd (%p2402_p7), %s481_s20, 4294959104  ;;  %s2488_s18 = scalar_lea.vmem [#allocation7], %s1551_s7  ;;  %s501_s2 = scalar_lea.sflag [#allocation9], %s2476_s11 }
  0x76   : > { %s2491_s3 = scalar_lea.vmem [#allocation8], %s1551_s7 }
  0x77   : > { %2098 = dma.done.wait (%p2402_p7), %s501_s2, 4112  }
  0x78   : > { %2100 = vsyncadd (%p2402_p7), %s501_s2, 4294963184  ;;  %v641_v0 = vld [vmem:[%s2482_s15 + $0x78] sm:$0xff]  ;;  %v640_v1 = vld [vmem:[%s2482_s15 + $0x70] sm:$0xff]  ;;  %s3123_s1 = sld [smem:[#allocation25_spill]]  ;;  %s2719_s12 = scalar_lea.vmem [#allocation10], %s482_s25 }
  0x79   : > { %v657_v2 = vld [vmem:[%s2482_s15 + $0xf8] sm:$0xff]  ;;  %1578 = vmatpush.msra.mxu2 %v641_v0  ;;  %v656_v3 = vld [vmem:[%s2482_s15 + $0xf0] sm:$0xff]  ;;  %v639_v4 = vld [vmem:[%s2482_s15 + $0x68] sm:$0xff]  ;;  %662 = vmatpush.msra.mxu0 %v641_v0  ;;  %s3124_s27 = sld [smem:[#allocation43_spill]]  ;;  %s567_s8 = sand.u32 1, %s2115_s10  }
  0x7a   : > { %1594 = vmatpush.msra.mxu3 %v657_v2  ;;  %v655_v5 = vld [vmem:[%s2482_s15 + $0xe8] sm:$0xff]  ;;  %727 = vmatpush.msra.mxu1 %v657_v2  ;;  %v638_v6 = vld [vmem:[%s2482_s15 + $0x60] sm:$0xff]  ;;  %v637_v8 = vld [vmem:[%s2482_s15 + $0x58] sm:$0xff]  ;;  %s3125_s28 = sld [smem:[#allocation44_spill]]  ;;  %s1189_s16 = scalar_lea.sflag [#allocation4], %s567_s8 }
  0x7b   : > { %1579 = vmatpush.msra.mxu2 %v640_v1  ;;  %v654_v7 = vld [vmem:[%s2482_s15 + $0xe0] sm:$0xff]  ;;  %663 = vmatpush.msra.mxu0 %v640_v1  ;;  %v653_v9 = vld [vmem:[%s2482_s15 + $0xd8] sm:$0xff]  ;;  %v636_v10 = vld [vmem:[%s2482_s15 + $0x50] sm:$0xff]  ;;  %s3126_s5 = sld [smem:[#allocation24_spill]] }
  0x7c   : > { %1595 = vmatpush.msra.mxu3 %v656_v3  ;;  %728 = vmatpush.msra.mxu1 %v656_v3  ;;  %v652_v11 = vld [vmem:[%s2482_s15 + $0xd0] sm:$0xff]  ;;  %v635_v12 = vld [vmem:[%s2482_s15 + $0x48] sm:$0xff]  ;;  %v634_v14 = vld [vmem:[%s2482_s15 + $0x40] sm:$0xff]  ;;  %s3127_s25 = sld [smem:[#allocation26_spill]] }
  0x7d   : > { %1580 = vmatpush.msra.mxu2 %v639_v4  ;;  %664 = vmatpush.msra.mxu0 %v639_v4  ;;  %v651_v13 = vld [vmem:[%s2482_s15 + $0xc8] sm:$0xff]  ;;  %v650_v15 = vld [vmem:[%s2482_s15 + $0xc0] sm:$0xff]  ;;  %v633_v16 = vld [vmem:[%s2482_s15 + $0x38] sm:$0xff]  ;;  %s3128_s21 = sld [smem:[#allocation46_spill]] }
  0x7e   : > { %1596 = vmatpush.msra.mxu3 %v655_v5  ;;  %729 = vmatpush.msra.mxu1 %v655_v5  ;;  %v649_v17 = vld [vmem:[%s2482_s15 + $0xb8] sm:$0xff]  ;;  %v632_v18 = vld [vmem:[%s2482_s15 + $0x30] sm:$0xff]  ;;  %v631_v20 = vld [vmem:[%s2482_s15 + $0x28] sm:$0xff]  ;;  %p585_p3 = scmp.lt.s32.totalorder %s3123_s1, 1  ;;  %s1561_s20 = sshll.u32 %s3123_s1, 5 }
  0x7f   : > { %1581 = vmatpush.msra.mxu2 %v638_v6  ;;  %665 = vmatpush.msra.mxu0 %v638_v6  ;;  %v648_v19 = vld [vmem:[%s2482_s15 + $0xb0] sm:$0xff]  ;;  %v647_v21 = vld [vmem:[%s2482_s15 + $0xa8] sm:$0xff]  ;;  %v630_v22 = vld [vmem:[%s2482_s15 + $0x20] sm:$0xff] }
  0x80   : > { %1597 = vmatpush.msra.mxu3 %v654_v7  ;;  %730 = vmatpush.msra.mxu1 %v654_v7  ;;  %v646_v23 = vld [vmem:[%s2482_s15 + $0xa0] sm:$0xff]  ;;  %v629_v24 = vld [vmem:[%s2482_s15 + $0x18] sm:$0xff]  ;;  %v628_v26 = vld [vmem:[%s2482_s15 + $0x10] sm:$0xff]  ;;  %s2539_s26 = scalar_select %p585_p3, %s3123_s1, 1 }
  0x81   : > { %1582 = vmatpush.msra.mxu2 %v637_v8  ;;  %666 = vmatpush.msra.mxu0 %v637_v8  ;;  %v645_v25 = vld [vmem:[%s2482_s15 + $0x98] sm:$0xff]  ;;  %v644_v27 = vld [vmem:[%s2482_s15 + $0x90] sm:$0xff]  ;;  %v627_v28 = vld [vmem:[%s2482_s15 + $0x8] sm:$0xff]  ;;  %s1560_s7 = sshll.u32 %s3126_s5, 4 }
  0x82   : > { %1598 = vmatpush.msra.mxu3 %v653_v9  ;;  %731 = vmatpush.msra.mxu1 %v653_v9  ;;  %v643_v29 = vld [vmem:[%s2482_s15 + $0x88] sm:$0xff]  ;;  %v626_v30 = vld [vmem:[%s2482_s15] sm:$0xff]  ;;  %v807_v34 = vld [vmem:[%s2488_s18 + $0x78] sm:$0xff]  ;;  %s587_s17 = scalar_lea.vmem %s3124_s27, %s2539_s26  ;;  %s590_s29 = scalar_lea.vmem %s3125_s28, %s2539_s26 }
  0x83   : > { %1583 = vmatpush.msra.mxu2 %v636_v10  ;;  %667 = vmatpush.msra.mxu0 %v636_v10  ;;  %v642_v31 = vld [vmem:[%s2482_s15 + $0x80] sm:$0xff]  ;;  %v2533_v33 = vld [vmem:[%s2469_s9 + $0x88] sm:$0xff]  ;;  %v823_v35 = vld [vmem:[%s2488_s18 + $0xf8] sm:$0xff]  ;;  %s1210_s15 = sadd.s32 %s1561_s20, %s1560_s7  ;;  %s3129_s6 = smov %s3128_s21 }
  0x84   : > { %1599 = vmatpush.msra.mxu3 %v652_v11  ;;  %732 = vmatpush.msra.mxu1 %v652_v11  ;;  %v2530_v32 = vld [vmem:[%s2469_s9 + $0x80] sm:$0xff]  ;;  %v806_v36 = vld [vmem:[%s2488_s18 + $0x70] sm:$0xff]  ;;  %v2549_v39 = vld [vmem:[%s2469_s9 + $0x8] sm:$0xff] }
  0x85   : > { %1584 = vmatpush.msra.mxu2 %v635_v12  ;;  %668 = vmatpush.msra.mxu0 %v635_v12  ;;  %v822_v37 = vld [vmem:[%s2488_s18 + $0xf0] sm:$0xff]  ;;  %v2546_v38 = vld [vmem:[%s2469_s9] sm:$0xff]  ;;  %v973_v40 = vld [vmem:[%s2491_s3 + $0x78] sm:$0xff] }
  0x86   : > { %1600 = vmatpush.msra.mxu3 %v651_v13  ;;  %733 = vmatpush.msra.mxu1 %v651_v13  ;;  %v805_v41 = vld [vmem:[%s2488_s18 + $0x68] sm:$0xff]  ;;  %v989_v42 = vld [vmem:[%s2491_s3 + $0xf8] sm:$0xff]  ;;  %v972_v44 = vld [vmem:[%s2491_s3 + $0x70] sm:$0xff] }
  0x87   : > { %1585 = vmatpush.msra.mxu2 %v634_v14  ;;  %669 = vmatpush.msra.mxu0 %v634_v14  ;;  %v821_v43 = vld [vmem:[%s2488_s18 + $0xe8] sm:$0xff]  ;;  %v804_v45 = vld [vmem:[%s2488_s18 + $0x60] sm:$0xff]  ;;  %v2564_v46 = vld [vmem:[%s2469_s9 + $0x90] sm:$0xff] }
  0x88   : > { %1601 = vmatpush.msra.mxu3 %v650_v15  ;;  %734 = vmatpush.msra.mxu1 %v650_v15  ;;  %v2567_v47 = vld [vmem:[%s2469_s9 + $0x98] sm:$0xff]  ;;  %v988_v48 = vld [vmem:[%s2491_s3 + $0xf0] sm:$0xff]  ;;  %v820_v49 = vld [vmem:[%s2488_s18 + $0xe0] sm:$0xff] }
  0x89   : > { %1586 = vmatpush.msra.mxu2 %v633_v16  ;;  %670 = vmatpush.msra.mxu0 %v633_v16  ;;  %v971_v50 = vld [vmem:[%s2491_s3 + $0x68] sm:$0xff]  ;;  %v803_v51 = vld [vmem:[%s2488_s18 + $0x58] sm:$0xff]  ;;  %v2578_v54 = vld [vmem:[%s2469_s9 + $0x10] sm:$0xff] }
  0x8a   : > { %1602 = vmatpush.msra.mxu3 %v649_v17  ;;  %735 = vmatpush.msra.mxu1 %v649_v17  ;;  %v987_v52 = vld [vmem:[%s2491_s3 + $0xe8] sm:$0xff]  ;;  %v819_v53 = vld [vmem:[%s2488_s18 + $0xd8] sm:$0xff]  ;;  %v970_v56 = vld [vmem:[%s2491_s3 + $0x60] sm:$0xff] }
  0x8b   : > { %1587 = vmatpush.msra.mxu2 %v632_v18  ;;  %671 = vmatpush.msra.mxu0 %v632_v18  ;;  %v2581_v55 = vld [vmem:[%s2469_s9 + $0x18] sm:$0xff]  ;;  %v802_v57 = vld [vmem:[%s2488_s18 + $0x50] sm:$0xff]  ;;  %v986_v58 = vld [vmem:[%s2491_s3 + $0xe0] sm:$0xff] }
  0x8c   : > { %1603 = vmatpush.msra.mxu3 %v648_v19  ;;  %736 = vmatpush.msra.mxu1 %v648_v19  ;;  %v818_v59 = vld [vmem:[%s2488_s18 + $0xd0] sm:$0xff]  ;;  %v969_v60 = vld [vmem:[%s2491_s3 + $0x58] sm:$0xff]  ;;  %v801_v61 = vld [vmem:[%s2488_s18 + $0x48] sm:$0xff] }
  0x8d   : > { %1588 = vmatpush.msra.mxu2 %v631_v20  ;;  %672 = vmatpush.msra.mxu0 %v631_v20  ;;  %v2592_v62 = vld [vmem:[%s2469_s9 + $0xa0] sm:$0xff]  ;;  %v2595_v63 = vld [vmem:[%s2469_s9 + $0xa8] sm:$0xff]  ;;  %v985_v0 = vld [vmem:[%s2491_s3 + $0xd8] sm:$0xff] }
  0x8e   : > { %1604 = vmatpush.msra.mxu3 %v647_v21  ;;  %737 = vmatpush.msra.mxu1 %v647_v21  ;;  %v817_v1 = vld [vmem:[%s2488_s18 + $0xc8] sm:$0xff]  ;;  %v968_v2 = vld [vmem:[%s2491_s3 + $0x50] sm:$0xff]  ;;  %v800_v3 = vld [vmem:[%s2488_s18 + $0x40] sm:$0xff] }
  0x8f   : > { %1589 = vmatpush.msra.mxu2 %v630_v22  ;;  %673 = vmatpush.msra.mxu0 %v630_v22  ;;  %v984_v4 = vld [vmem:[%s2491_s3 + $0xd0] sm:$0xff]  ;;  %v816_v5 = vld [vmem:[%s2488_s18 + $0xc0] sm:$0xff]  ;;  %v2609_v7 = vld [vmem:[%s2469_s9 + $0x28] sm:$0xff] }
  0x90   : > { %1605 = vmatpush.msra.mxu3 %v646_v23  ;;  %738 = vmatpush.msra.mxu1 %v646_v23  ;;  %v2606_v6 = vld [vmem:[%s2469_s9 + $0x20] sm:$0xff]  ;;  %v967_v8 = vld [vmem:[%s2491_s3 + $0x48] sm:$0xff]  ;;  %v799_v9 = vld [vmem:[%s2488_s18 + $0x38] sm:$0xff] }
  0x91   : > { %1590 = vmatpush.msra.mxu2 %v629_v24  ;;  %674 = vmatpush.msra.mxu0 %v629_v24  ;;  %v983_v10 = vld [vmem:[%s2491_s3 + $0xc8] sm:$0xff]  ;;  %v815_v11 = vld [vmem:[%s2488_s18 + $0xb8] sm:$0xff]  ;;  %v966_v12 = vld [vmem:[%s2491_s3 + $0x40] sm:$0xff] }
  0x92   : > { %1606 = vmatpush.msra.mxu3 %v645_v25  ;;  %739 = vmatpush.msra.mxu1 %v645_v25  ;;  %v798_v13 = vld [vmem:[%s2488_s18 + $0x30] sm:$0xff]  ;;  %v2623_v15 = vld [vmem:[%s2469_s9 + $0xb8] sm:$0xff]  ;;  %v982_v16 = vld [vmem:[%s2491_s3 + $0xc0] sm:$0xff] }
  0x93   : > { %1591 = vmatpush.msra.mxu2 %v628_v26  ;;  %675 = vmatpush.msra.mxu0 %v628_v26  ;;  %v2620_v14 = vld [vmem:[%s2469_s9 + $0xb0] sm:$0xff]  ;;  %v965_v18 = vld [vmem:[%s2491_s3 + $0x38] sm:$0xff]  ;;  %v797_v19 = vld [vmem:[%s2488_s18 + $0x28] sm:$0xff] }
  0x94   : > { %1607 = vmatpush.msra.mxu3 %v644_v27  ;;  %740 = vmatpush.msra.mxu1 %v644_v27  ;;  %v814_v17 = vld [vmem:[%s2488_s18 + $0xb0] sm:$0xff]  ;;  %v981_v20 = vld [vmem:[%s2491_s3 + $0xb8] sm:$0xff]  ;;  %v813_v21 = vld [vmem:[%s2488_s18 + $0xa8] sm:$0xff] }
  0x95   : > { %1592 = vmatpush.msra.mxu2 %v627_v28  ;;  %676 = vmatpush.msra.mxu0 %v627_v28  ;;  %v2634_v22 = vld [vmem:[%s2469_s9 + $0x30] sm:$0xff]  ;;  %v2637_v23 = vld [vmem:[%s2469_s9 + $0x38] sm:$0xff]  ;;  %v796_v25 = vld [vmem:[%s2488_s18 + $0x20] sm:$0xff] }
  0x96   : > { %1608 = vmatpush.msra.mxu3 %v643_v29  ;;  %741 = vmatpush.msra.mxu1 %v643_v29  ;;  %v964_v24 = vld [vmem:[%s2491_s3 + $0x30] sm:$0xff]  ;;  %v812_v27 = vld [vmem:[%s2488_s18 + $0xa0] sm:$0xff]  ;;  %v963_v28 = vld [vmem:[%s2491_s3 + $0x28] sm:$0xff] }
  0x97   : > { %1593 = vmatpush.msra.mxu2 %v626_v30  ;;  %677 = vmatpush.msra.mxu0 %v626_v30  ;;  %v980_v26 = vld [vmem:[%s2491_s3 + $0xb0] sm:$0xff]  ;;  %v795_v29 = vld [vmem:[%s2488_s18 + $0x18] sm:$0xff]  ;;  %v2648_v30 = vld [vmem:[%s2469_s9 + $0xc0] sm:$0xff] }
  0x98   : > { %1609 = vmatpush.msra.mxu3 %v642_v31  ;;  %702 = vmatmul.f32.vlgmr.msra.gmra.mxu2 %v2530_v32 }
  0x99   : > { %767 = vmatmul.f32.vlgmr.msra.gmra.mxu3 %v2533_v33  ;;  %828 = vmatpush.msrb.mxu2 %v807_v34  ;;  %v979_v34 = vld [vmem:[%s2491_s3 + $0xa8] sm:$0xff] }
  0x9a   : > { %893 = vmatpush.msrb.mxu3 %v823_v35  ;;  %742 = vmatpush.msra.mxu1 %v642_v31  ;;  %v2651_v31 = vld [vmem:[%s2469_s9 + $0xc8] sm:$0xff]  ;;  %v811_v35 = vld [vmem:[%s2488_s18 + $0x98] sm:$0xff] }
  0x9b   : > { %829 = vmatpush.msrb.mxu2 %v806_v36  ;;  %678 = vmatmul.f32.vlgmr.msra.gmra.mxu0 %v2546_v38  ;;  %v962_v36 = vld [vmem:[%s2491_s3 + $0x20] sm:$0xff] }
  0x9c   : > { %894 = vmatpush.msrb.mxu3 %v822_v37  ;;  %743 = vmatmul.f32.vlgmr.msra.gmra.mxu1 %v2549_v39  ;;  %v794_v37 = vld [vmem:[%s2488_s18 + $0x10] sm:$0xff] }
  0x9d   : > { %994 = vmatpush.msrb.mxu0 %v973_v40  ;;  %830 = vmatpush.msrb.mxu2 %v805_v41  ;;  %v978_v40 = vld [vmem:[%s2491_s3 + $0xa0] sm:$0xff]  ;;  %v810_v41 = vld [vmem:[%s2488_s18 + $0x90] sm:$0xff] }
  0x9e   : > { %1059 = vmatpush.msrb.mxu1 %v989_v42  ;;  %895 = vmatpush.msrb.mxu3 %v821_v43  ;;  %v2662_v42 = vld [vmem:[%s2469_s9 + $0x40] sm:$0xff]  ;;  %v2665_v43 = vld [vmem:[%s2469_s9 + $0x48] sm:$0xff] }
  0x9f   : > { %995 = vmatpush.msrb.mxu0 %v972_v44  ;;  %831 = vmatpush.msrb.mxu2 %v804_v45  ;;  %v961_v44 = vld [vmem:[%s2491_s3 + $0x18] sm:$0xff]  ;;  %v793_v45 = vld [vmem:[%s2488_s18 + $0x8] sm:$0xff] }
  0xa0   : > { %705 = vmatmul.f32.gmra.mxu2 %v2564_v46  ;;  %1060 = vmatpush.msrb.mxu1 %v988_v48  ;;  %v977_v48 = vld [vmem:[%s2491_s3 + $0x98] sm:$0xff] }
  0xa1   : > { %770 = vmatmul.f32.gmra.mxu3 %v2567_v47  ;;  %996 = vmatpush.msrb.mxu0 %v971_v50  ;;  %v960_v50 = vld [vmem:[%s2491_s3 + $0x10] sm:$0xff] }
  0xa2   : > { %896 = vmatpush.msrb.mxu3 %v820_v49  ;;  %832 = vmatpush.msrb.mxu2 %v803_v51  ;;  %v809_v49 = vld [vmem:[%s2488_s18 + $0x88] sm:$0xff]  ;;  %v792_v51 = vld [vmem:[%s2488_s18] sm:$0xff] }
  0xa3   : > { %1061 = vmatpush.msrb.mxu1 %v987_v52  ;;  %681 = vmatmul.f32.gmra.mxu0 %v2578_v54  ;;  %v2676_v52 = vld [vmem:[%s2469_s9 + $0xd0] sm:$0xff] }
  0xa4   : > { %897 = vmatpush.msrb.mxu3 %v819_v53  ;;  %746 = vmatmul.f32.gmra.mxu1 %v2581_v55  ;;  %v2679_v53 = vld [vmem:[%s2469_s9 + $0xd8] sm:$0xff] }
  0xa5   : > { %997 = vmatpush.msrb.mxu0 %v970_v56  ;;  %833 = vmatpush.msrb.mxu2 %v802_v57  ;;  %v976_v56 = vld [vmem:[%s2491_s3 + $0x90] sm:$0xff]  ;;  %v808_v57 = vld [vmem:[%s2488_s18 + $0x80] sm:$0xff]  ;;  %s1562_s18 = sshll.u32 %s3127_s25, 6 }
  0xa6   : > { %1062 = vmatpush.msrb.mxu1 %v986_v58  ;;  %898 = vmatpush.msrb.mxu3 %v818_v59  ;;  %v959_v58 = vld [vmem:[%s2491_s3 + $0x8] sm:$0xff]  ;;  %s1212_s2 = sadd.s32 %s1562_s18, %s1210_s15 }
  0xa7   : > { %998 = vmatpush.msrb.mxu0 %v969_v60  ;;  %834 = vmatpush.msrb.mxu2 %v801_v61  ;;  %v975_v59 = vld [vmem:[%s2491_s3 + $0x88] sm:$0xff]  ;;  %v604_v60 = vld [vmem:[%s2469_s9 + $0x50] sm:$0xff]  ;;  %v605_v61 = vld [vmem:[%s2469_s9 + $0x58] sm:$0xff]  ;;  %s2830_s19 = sshll.u32 %s1212_s2, 3 }
  0xa8   : > { %708 = vmatmul.f32.gmra.mxu2 %v2592_v62  ;;  %1063 = vmatpush.msrb.mxu1 %v985_v0  ;;  %v958_v0 = vld [vmem:[%s2491_s3] sm:$0xff]  ;;  %s1214_s23 = scalar_lea.hbm %s3128_s21, %s2830_s19 }
  0xa9   : > { %773 = vmatmul.f32.gmra.mxu3 %v2595_v63  ;;  %999 = vmatpush.msrb.mxu0 %v968_v2  ;;  %v2692_v2 = vld [vmem:[%s2469_s9 + $0xe0] sm:$0xff] }
  0xaa   : > { %899 = vmatpush.msrb.mxu3 %v817_v1  ;;  %835 = vmatpush.msrb.mxu2 %v800_v3  ;;  %v974_v1 = vld [vmem:[%s2491_s3 + $0x80] sm:$0xff]  ;;  %v2695_v3 = vld [vmem:[%s2469_s9 + $0xe8] sm:$0xff] }
  0xab   : > { %1064 = vmatpush.msrb.mxu1 %v984_v4  ;;  %684 = vmatmul.f32.gmra.mxu0 %v2606_v6  ;;  %v606_v4 = vld [vmem:[%s2469_s9 + $0x60] sm:$0xff] }
  0xac   : > { %900 = vmatpush.msrb.mxu3 %v816_v5  ;;  %749 = vmatmul.f32.gmra.mxu1 %v2609_v7  ;;  %v607_v5 = vld [vmem:[%s2469_s9 + $0x68] sm:$0xff] }
  0xad   : > { %1000 = vmatpush.msrb.mxu0 %v967_v8  ;;  %836 = vmatpush.msrb.mxu2 %v799_v9  ;;  %v2702_v8 = vld [vmem:[%s2469_s9 + $0xf0] sm:$0xff]  ;;  %v2705_v9 = vld [vmem:[%s2469_s9 + $0xf8] sm:$0xff] }
  0xae   : > { %1065 = vmatpush.msrb.mxu1 %v983_v10  ;;  %901 = vmatpush.msrb.mxu3 %v815_v11  ;;  %v608_v10 = vld [vmem:[%s2469_s9 + $0x70] sm:$0xff]  ;;  %v609_v11 = vld [vmem:[%s2469_s9 + $0x78] sm:$0xff]  ;;  %s2752_s9 = sshll.u32 %s567_s8, 7 }
  0xaf   : > { %1001 = vmatpush.msrb.mxu0 %v966_v12  ;;  %837 = vmatpush.msrb.mxu2 %v798_v13  ;;  %s2758_s0 = scalar_lea.vmem [#allocation11], %s2752_s9 }
  0xb0   : > { %711 = vmatmul.f32.gmra.mxu2 %v2620_v14  ;;  %1066 = vmatpush.msrb.mxu1 %v982_v16  ;;  %s1215_s26 = sshll.u32 %s2758_s0, 4  ;;  %s1216_s26 = int_to_ptr.vmem [resolvable:$true] %s1215_s26 }
  0xb1   : > { %776 = vmatmul.f32.gmra.mxu3 %v2623_v15  ;;  %1002 = vmatpush.msrb.mxu0 %v965_v18 }
  0xb2   : > { %902 = vmatpush.msrb.mxu3 %v814_v17  ;;  %838 = vmatpush.msrb.mxu2 %v797_v19 }
  0xb3   : > { %1067 = vmatpush.msrb.mxu1 %v981_v20  ;;  %687 = vmatmul.f32.gmra.mxu0 %v2634_v22 }
  0xb4   : > { %903 = vmatpush.msrb.mxu3 %v813_v21  ;;  %752 = vmatmul.f32.gmra.mxu1 %v2637_v23 }
  0xb5   : > { %1003 = vmatpush.msrb.mxu0 %v964_v24  ;;  %839 = vmatpush.msrb.mxu2 %v796_v25 }
  0xb6   : > { %1068 = vmatpush.msrb.mxu1 %v980_v26  ;;  %904 = vmatpush.msrb.mxu3 %v812_v27 }
  0xb7   : > { %1004 = vmatpush.msrb.mxu0 %v963_v28  ;;  %840 = vmatpush.msrb.mxu2 %v795_v29 }
  0xb8   : > { %714 = vmatmul.f32.gmra.mxu2 %v2648_v30  ;;  %1069 = vmatpush.msrb.mxu1 %v979_v34 }
  0xb9   : > { %779 = vmatmul.f32.gmra.mxu3 %v2651_v31  ;;  %1005 = vmatpush.msrb.mxu0 %v962_v36 }
  0xba   : > { %905 = vmatpush.msrb.mxu3 %v811_v35  ;;  %841 = vmatpush.msrb.mxu2 %v794_v37 }
  0xbb   : > { %1070 = vmatpush.msrb.mxu1 %v978_v40  ;;  %690 = vmatmul.f32.gmra.mxu0 %v2662_v42 }
  0xbc   : > { %906 = vmatpush.msrb.mxu3 %v810_v41  ;;  %755 = vmatmul.f32.gmra.mxu1 %v2665_v43 }
  0xbd   : > { %1006 = vmatpush.msrb.mxu0 %v961_v44  ;;  %842 = vmatpush.msrb.mxu2 %v793_v45 }
  0xbe   : > { %1071 = vmatpush.msrb.mxu1 %v977_v48  ;;  %907 = vmatpush.msrb.mxu3 %v809_v49 }
  0xbf   : > { %1007 = vmatpush.msrb.mxu0 %v960_v50  ;;  %843 = vmatpush.msrb.mxu2 %v792_v51 }
  0xc0   : > { %717 = vmatmul.f32.gmra.mxu2 %v2676_v52  ;;  %1072 = vmatpush.msrb.mxu1 %v976_v56 }
  0xc1   : > { %782 = vmatmul.f32.gmra.mxu3 %v2679_v53  ;;  %1008 = vmatpush.msrb.mxu0 %v959_v58 }
  0xc2   : > { %908 = vmatpush.msrb.mxu3 %v808_v57  ;;  %1073 = vmatpush.msrb.mxu1 %v975_v59 }
  0xc3   : > { %693 = vmatmul.f32.gmra.mxu0 %v604_v60 }
  0xc4   : > { %758 = vmatmul.f32.gmra.mxu1 %v605_v61  ;;  %1009 = vmatpush.msrb.mxu0 %v958_v0 }
  0xc5   : > { %1074 = vmatpush.msrb.mxu1 %v974_v1 }
  0xc8   : > { %720 = vmatmul.f32.gmra.mxu2 %v2692_v2 }
  0xc9   : > { %785 = vmatmul.f32.gmra.mxu3 %v2695_v3 }
  0xcb   : > { %696 = vmatmul.f32.gmra.mxu0 %v606_v4 }
  0xcc   : > { %761 = vmatmul.f32.gmra.mxu1 %v607_v5 }
  0xd0   : > { %723 = vmatmul.f32.gmra.mxu2 %v2702_v8 }
  0xd1   : > { %788 = vmatmul.f32.gmra.mxu3 %v2705_v9 }
  0xd3   : > { %699 = vmatmul.f32.gmra.mxu0 %v608_v10 }
  0xd4   : > { %764 = vmatmul.f32.gmra.mxu1 %v609_v11 }
  0xd8   : > { %844 = vmatmul.f32.vlgmr.msrb.gmra.mxu2 %v2546_v38 }
  0xd9   : > { %909 = vmatmul.f32.vlgmr.msrb.gmra.mxu3 %v2549_v39 }
  0xdb   : > { %1010 = vmatmul.f32.vlgmr.msrb.gmra.mxu0 %v2546_v38  ;;  %v2744_v38 = vld [vmem:[%s587_s17] ss:$0 sm:$0xff] }
  0xdc   : > { %1075 = vmatmul.f32.vlgmr.msrb.gmra.mxu1 %v2549_v39 }
  0xe0   : > { %847 = vmatmul.f32.gmra.mxu2 %v2578_v54 }
  0xe1   : > { %912 = vmatmul.f32.gmra.mxu3 %v2581_v55 }
  0xe3   : > { %1013 = vmatmul.f32.gmra.mxu0 %v2578_v54 }
  0xe4   : > { %1078 = vmatmul.f32.gmra.mxu1 %v2581_v55 }
  0xe8   : > { %850 = vmatmul.f32.gmra.mxu2 %v2606_v6 }
  0xe9   : > { %915 = vmatmul.f32.gmra.mxu3 %v2609_v7 }
  0xeb   : > { %1016 = vmatmul.f32.gmra.mxu0 %v2606_v6 }
  0xec   : > { %1081 = vmatmul.f32.gmra.mxu1 %v2609_v7 }
  0xf0   : > { %853 = vmatmul.f32.gmra.mxu2 %v2634_v22 }
  0xf1   : > { %918 = vmatmul.f32.gmra.mxu3 %v2637_v23 }
  0xf3   : > { %1019 = vmatmul.f32.gmra.mxu0 %v2634_v22 }
  0xf4   : > { %1084 = vmatmul.f32.gmra.mxu1 %v2637_v23 }
  0xf8   : > { %856 = vmatmul.f32.gmra.mxu2 %v2662_v42 }
  0xf9   : > { %921 = vmatmul.f32.gmra.mxu3 %v2665_v43 }
  0xfb   : > { %1022 = vmatmul.f32.gmra.mxu0 %v2662_v42 }
  0xfc   : > { %1087 = vmatmul.f32.gmra.mxu1 %v2665_v43 }
 0x100   : > { %859 = vmatmul.f32.gmra.mxu2 %v604_v60 }
 0x101   : > { %924 = vmatmul.f32.gmra.mxu3 %v605_v61 }
 0x103   : > { %1025 = vmatmul.f32.gmra.mxu0 %v604_v60 }
 0x104   : > { %1090 = vmatmul.f32.gmra.mxu1 %v605_v61 }
 0x108   : > { %862 = vmatmul.f32.gmra.mxu2 %v606_v4 }
 0x109   : > { %927 = vmatmul.f32.gmra.mxu3 %v607_v5 }
 0x10b   : > { %1028 = vmatmul.f32.gmra.mxu0 %v606_v4 }
 0x10c   : > { %1093 = vmatmul.f32.gmra.mxu1 %v607_v5 }
 0x110   : > { %865 = vmatmul.f32.gmra.mxu2 %v608_v10 }
 0x111   : > { %930 = vmatmul.f32.gmra.mxu3 %v609_v11 }
 0x113   : > { %1031 = vmatmul.f32.gmra.mxu0 %v608_v10 }
 0x114   : > { %1096 = vmatmul.f32.gmra.mxu1 %v609_v11 }
 0x118   : > { %868 = vmatmul.f32.gmra.mxu2 %v2530_v32  ;;  %v679_v39 = vpop.f32.mrf.mxu0 }
 0x119   : > { %933 = vmatmul.f32.gmra.mxu3 %v2533_v33  ;;  %v744_v54 = vpop.f32.mrf.mxu1  ;;  %v680_v55 = vadd.f32 %v2744_v38, %v679_v39 }
 0x11b   : > { %v703_v6 = vpop.f32.mrf.mxu2  ;;  %v745_v13 = vadd.f32 %v744_v54, %v680_v55  ;;  %1034 = vmatmul.f32.gmra.mxu0 %v2530_v32 }
 0x11c   : > { %v768_v7 = vpop.f32.mrf.mxu3  ;;  %v704_v12 = vadd.f32 %v2744_v38, %v703_v6  ;;  %1099 = vmatmul.f32.gmra.mxu1 %v2533_v33 }
 0x11d   : > { %v1124_v17 = vmul.f32 0.088388346, %v745_v13 }
 0x11e   : > { %v769_v16 = vadd.f32 %v768_v7, %v704_v12 }
 0x11f   : > { %1140 = vst [vmem:[%s2758_s0] sm:$0xff] %v1124_v17 }
 0x120   : > { %v1132_v18 = vmul.f32 0.088388346, %v769_v16  ;;  %871 = vmatmul.f32.gmra.mxu2 %v2564_v46  ;;  %v682_v19 = vpop.f32.mrf.mxu0 }
 0x121   : > { %936 = vmatmul.f32.gmra.mxu3 %v2567_v47  ;;  %v747_v20 = vpop.f32.mrf.mxu1  ;;  %v683_v32 = vadd.f32 %v2744_v38, %v682_v19 }
 0x122   : > { %1148 = vst [vmem:[%s2758_s0 + $0x40] sm:$0xff] %v1132_v18 }
 0x123   : > { %v706_v33 = vpop.f32.mrf.mxu2  ;;  %v748_v23 = vadd.f32 %v747_v20, %v683_v32  ;;  %1037 = vmatmul.f32.gmra.mxu0 %v2564_v46 }
 0x124   : > { %v771_v21 = vpop.f32.mrf.mxu3  ;;  %v707_v22 = vadd.f32 %v2744_v38, %v706_v33  ;;  %1102 = vmatmul.f32.gmra.mxu1 %v2567_v47 }
 0x125   : > { %v1125_v25 = vmul.f32 0.088388346, %v748_v23 }
 0x126   : > { %v772_v24 = vadd.f32 %v771_v21, %v707_v22 }
 0x127   : > { %1141 = vst [vmem:[%s2758_s0 + $0x8] sm:$0xff] %v1125_v25  ;;  %v2820_v25 = vld [vmem:[%s2719_s12] ss:$0 sm:$0xff]  ;;  %s2841_s12 = scalar_lea.vmem [#allocation14], %s2752_s9 }
 0x128   : > { %v1133_v26 = vmul.f32 0.088388346, %v772_v24  ;;  %874 = vmatmul.f32.gmra.mxu2 %v2592_v62  ;;  %v685_v27 = vpop.f32.mrf.mxu0 }
 0x129   : > { %939 = vmatmul.f32.gmra.mxu3 %v2595_v63  ;;  %v750_v28 = vpop.f32.mrf.mxu1  ;;  %v686_v29 = vadd.f32 %v2744_v38, %v685_v27  ;;  %v2828_v27 = vld [vmem:[%s590_s29] ss:$0 sm:$0xff]  ;;  %s1217_s29 = sshll.u32 %s1214_s23, 4  ;;  %s1218_s29 = int_to_ptr.hbm [resolvable:$true] %s1217_s29 }
 0x12a   : > { %1149 = vst [vmem:[%s2758_s0 + $0x48] sm:$0xff] %v1133_v26  ;;  %s1955_s5 = sshra.s32 %s1218_s29, 4  ;;  %s1956_s5 = int_to_ptr.hbm [resolvable:$true] %s1955_s5 }
 0x12b   : > { %v709_v34 = vpop.f32.mrf.mxu2  ;;  %v751_v47 = vadd.f32 %v750_v28, %v686_v29  ;;  %1040 = vmatmul.f32.gmra.mxu0 %v2592_v62  ;;  %s1957_s25 = scalar_lea.hbm %s1956_s5, 128  ;;  %p1962_p4 = scmp.lt.s32.totalorder %s1956_s5, %s3129_s6 }
 0x12c   : > { %v774_v35 = vpop.f32.mrf.mxu3  ;;  %v710_v46 = vadd.f32 %v2744_v38, %v709_v34  ;;  %1105 = vmatmul.f32.gmra.mxu1 %v2595_v63  ;;  %p1958_p5 = scmp.ne.s32.totalorder %s1956_s5, %s1957_s25 }
 0x12d   : > { %v1126_v37 = vmul.f32 0.088388346, %v751_v47 }
 0x12e   : > { %v775_v36 = vadd.f32 %v774_v35, %v710_v46  ;;  %p1959_p8 = pnand %p1958_p5, %p2418_p13 }
 0x12f   : > { %1142 = vst [vmem:[%s2758_s0 + $0x10] sm:$0xff] %v1126_v37 }
 0x130   : > { %v1134_v40 = vmul.f32 0.088388346, %v775_v36  ;;  %877 = vmatmul.f32.gmra.mxu2 %v2620_v14  ;;  %v688_v41 = vpop.f32.mrf.mxu0  ;;  %p1960_p11 = pneg %p1959_p8 }
 0x131   : > { %942 = vmatmul.f32.gmra.mxu3 %v2623_v15  ;;  %v753_v42 = vpop.f32.mrf.mxu1  ;;  %v689_v43 = vadd.f32 %v2744_v38, %v688_v41 }
 0x132   : > { %1150 = vst [vmem:[%s2758_s0 + $0x50] sm:$0xff] %v1134_v40 }
 0x133   : > { %v712_v44 = vpop.f32.mrf.mxu2  ;;  %v754_v63 = vadd.f32 %v753_v42, %v689_v43  ;;  %1043 = vmatmul.f32.gmra.mxu0 %v2620_v14 }
 0x134   : > { %v777_v45 = vpop.f32.mrf.mxu3  ;;  %v713_v62 = vadd.f32 %v2744_v38, %v712_v44  ;;  %1108 = vmatmul.f32.gmra.mxu1 %v2623_v15 }
 0x135   : > { %v1127_v49 = vmul.f32 0.088388346, %v754_v63 }
 0x136   : > { %v778_v48 = vadd.f32 %v777_v45, %v713_v62 }
 0x137   : > { %1143 = vst [vmem:[%s2758_s0 + $0x18] sm:$0xff] %v1127_v49 }
 0x138   : > { %v1135_v50 = vmul.f32 0.088388346, %v778_v48  ;;  %880 = vmatmul.f32.gmra.mxu2 %v2648_v30  ;;  %v691_v51 = vpop.f32.mrf.mxu0 }
 0x139   : > { %945 = vmatmul.f32.gmra.mxu3 %v2651_v31  ;;  %v756_v56 = vpop.f32.mrf.mxu1  ;;  %v692_v57 = vadd.f32 %v2744_v38, %v691_v51 }
 0x13a   : > { %1151 = vst [vmem:[%s2758_s0 + $0x58] sm:$0xff] %v1135_v50 }
 0x13b   : > { %v715_v58 = vpop.f32.mrf.mxu2  ;;  %v757_v15 = vadd.f32 %v756_v56, %v692_v57  ;;  %1046 = vmatmul.f32.gmra.mxu0 %v2648_v30 }
 0x13c   : > { %v780_v59 = vpop.f32.mrf.mxu3  ;;  %v716_v14 = vadd.f32 %v2744_v38, %v715_v58  ;;  %1111 = vmatmul.f32.gmra.mxu1 %v2651_v31 }
 0x13d   : > { %v1128_v61 = vmul.f32 0.088388346, %v757_v15 }
 0x13e   : > { %v781_v60 = vadd.f32 %v780_v59, %v716_v14 }
 0x13f   : > { %1144 = vst [vmem:[%s2758_s0 + $0x20] sm:$0xff] %v1128_v61 }
 0x140   : > { %v1136_v0 = vmul.f32 0.088388346, %v781_v60  ;;  %883 = vmatmul.f32.gmra.mxu2 %v2676_v52  ;;  %v694_v1 = vpop.f32.mrf.mxu0 }
 0x141   : > { %948 = vmatmul.f32.gmra.mxu3 %v2679_v53  ;;  %v759_v4 = vpop.f32.mrf.mxu1  ;;  %v695_v5 = vadd.f32 %v2744_v38, %v694_v1 }
 0x142   : > { %1152 = vst [vmem:[%s2758_s0 + $0x60] sm:$0xff] %v1136_v0 }
 0x143   : > { %v718_v10 = vpop.f32.mrf.mxu2  ;;  %v760_v31 = vadd.f32 %v759_v4, %v695_v5  ;;  %1049 = vmatmul.f32.gmra.mxu0 %v2676_v52 }
 0x144   : > { %v783_v11 = vpop.f32.mrf.mxu3  ;;  %v719_v30 = vadd.f32 %v2744_v38, %v718_v10  ;;  %1114 = vmatmul.f32.gmra.mxu1 %v2679_v53 }
 0x145   : > { %v1129_v54 = vmul.f32 0.088388346, %v760_v31 }
 0x146   : > { %v784_v39 = vadd.f32 %v783_v11, %v719_v30 }
 0x147   : > { %1145 = vst [vmem:[%s2758_s0 + $0x28] sm:$0xff] %v1129_v54 }
 0x148   : > { %v1137_v55 = vmul.f32 0.088388346, %v784_v39  ;;  %886 = vmatmul.f32.gmra.mxu2 %v2692_v2  ;;  %v697_v6 = vpop.f32.mrf.mxu0 }
 0x149   : > { %951 = vmatmul.f32.gmra.mxu3 %v2695_v3  ;;  %v762_v7 = vpop.f32.mrf.mxu1  ;;  %v698_v12 = vadd.f32 %v2744_v38, %v697_v6 }
 0x14a   : > { %1153 = vst [vmem:[%s2758_s0 + $0x68] sm:$0xff] %v1137_v55 }
 0x14b   : > { %v721_v13 = vpop.f32.mrf.mxu2  ;;  %v763_v16 = vadd.f32 %v762_v7, %v698_v12  ;;  %1052 = vmatmul.f32.gmra.mxu0 %v2692_v2 }
 0x14c   : > { %v786_v52 = vpop.f32.mrf.mxu3  ;;  %v722_v53 = vadd.f32 %v2744_v38, %v721_v13  ;;  %1117 = vmatmul.f32.gmra.mxu1 %v2695_v3 }
 0x14d   : > { %v1130_v18 = vmul.f32 0.088388346, %v763_v16 }
 0x14e   : > { %v787_v17 = vadd.f32 %v786_v52, %v722_v53 }
 0x14f   : > { %1146 = vst [vmem:[%s2758_s0 + $0x30] sm:$0xff] %v1130_v18 }
 0x150   : > { %v1138_v19 = vmul.f32 0.088388346, %v787_v17  ;;  %889 = vmatmul.f32.gmra.mxu2 %v2702_v8  ;;  %v700_v20 = vpop.f32.mrf.mxu0 }
 0x151   : > { %954 = vmatmul.f32.gmra.mxu3 %v2705_v9  ;;  %v765_v32 = vpop.f32.mrf.mxu1  ;;  %v701_v33 = vadd.f32 %v2744_v38, %v700_v20 }
 0x152   : > { %1154 = vst [vmem:[%s2758_s0 + $0x70] sm:$0xff] %v1138_v19 }
 0x153   : > { %v724_v2 = vpop.f32.mrf.mxu2  ;;  %v766_v22 = vadd.f32 %v765_v32, %v701_v33  ;;  %1055 = vmatmul.f32.gmra.mxu0 %v2702_v8 }
 0x154   : > { %v789_v3 = vpop.f32.mrf.mxu3  ;;  %v725_v21 = vadd.f32 %v2744_v38, %v724_v2  ;;  %1120 = vmatmul.f32.gmra.mxu1 %v2705_v9 }
 0x155   : > { %v1131_v24 = vmul.f32 0.088388346, %v766_v22 }
 0x156   : > { %v790_v23 = vadd.f32 %v789_v3, %v725_v21 }
 0x157   : > { %1147 = vst [vmem:[%s2758_s0 + $0x38] sm:$0xff] %v1131_v24 }
 0x158   : > { %v1139_v26 = vmul.f32 0.088388346, %v790_v23  ;;  %v1011_v8 = vpop.f32.mrf.mxu0 }
 0x159   : > { %v1076_v9 = vpop.f32.mrf.mxu1  ;;  %v1012_v38 = vadd.f32 %v2820_v25, %v1011_v8 }
 0x15a   : > { %1155 = vst [vmem:[%s2758_s0 + $0x78] sm:$0xff] %v1139_v26  ;;  %s1961_s0 = scalar_lea.hbm %s3129_s6, 1024 }
 0x15b   : > { %v845_v28 = vpop.f32.mrf.mxu2  ;;  %v1077_v35 = vadd.f32 %v1076_v9, %v1012_v38  ;;  %p1963_p7 = scmp.lt.s32.totalorder %s1961_s0, %s1957_s25 }
 0x15c   : > { %v910_v29 = vpop.f32.mrf.mxu3  ;;  %v846_v34 = vadd.f32 %v2828_v27, %v845_v28 }
 0x15d   : > { %1172 = vst [vmem:[%s2841_s12] sm:$0xff] %v1077_v35  ;;  %p1964_p10 = por %p1963_p7, %p1962_p4 }
 0x15e   : > { %v911_v46 = vadd.f32 %v910_v29, %v846_v34 }
 0x15f   : > { %p1965_p12 = pnand %p1964_p10, %p1960_p11 }
 0x161   : > { %1968 = shalt.err (!%p1965_p12)
}
 0x162   : > { %s2177_s8 = smov 128   ;;  %s2178_s2 = smov 8   ;;  %v1014_v47 = vpop.f32.mrf.mxu0  ;;  %v1079_v36 = vpop.f32.mrf.mxu1 }
 0x163   : > { %1620 = dma.vmem_to_hbm [thread:$0]  (%p2418_p13), %s1216_s26, 2048, %s1218_s29, %s1189_s16, %s2177_s8, %s2177_s8, %s2178_s2   ;;  %v1015_v37 = vadd.f32 %v2820_v25, %v1014_v47  ;;  %v848_v40 = vpop.f32.mrf.mxu2 }
 0x164   : > { %s2860_s3 = scalar_lea.vmem [#allocation12], %s2752_s9  ;;  %v913_v41 = vpop.f32.mrf.mxu3  ;;  %v849_v42 = vadd.f32 %v2828_v27, %v848_v40  ;;  %s3130_s4 = sld [smem:[#allocation47_spill]] }
 0x165   : > { %1156 = vst [vmem:[%s2860_s3] sm:$0xff] %v911_v46  ;;  %v1080_v43 = vadd.f32 %v1079_v36, %v1015_v37  ;;  %s3131_s26 = sld [smem:[#allocation48_spill]]  ;;  %s1236_s16 = sshll.u32 %s2860_s3, 4  ;;  %s1237_s16 = int_to_ptr.vmem [resolvable:$true] %s1236_s16 }
 0x166   : > { %v914_v44 = vadd.f32 %v913_v41, %v849_v42  ;;  %s1257_s7 = sshll.u32 %s2841_s12, 4  ;;  %s2938_s7 = int_to_ptr.vmem [resolvable:$true] %s1257_s7 }
 0x167   : > { %1173 = vst [vmem:[%s2841_s12 + $0x8] sm:$0xff] %v1080_v43 }
 0x168   : > { %1157 = vst [vmem:[%s2860_s3 + $0x8] sm:$0xff] %v914_v44 }
 0x16a   : > { %v1017_v45 = vpop.f32.mrf.mxu0  ;;  %v1082_v62 = vpop.f32.mrf.mxu1  ;;  %s1235_s17 = scalar_lea.hbm %s3130_s4, %s2830_s19  ;;  %s1989_s9 = scalar_lea.hbm %s3130_s4, 1024 }
 0x16b   : > { %v1018_v63 = vadd.f32 %v2820_v25, %v1017_v45  ;;  %v851_v48 = vpop.f32.mrf.mxu2  ;;  %s1256_s29 = scalar_lea.hbm %s3131_s26, %s2830_s19  ;;  %s2929_s5 = sshll.u32 %s1235_s17, 4  ;;  %s1239_s5 = int_to_ptr.hbm [resolvable:$true] %s2929_s5 }
 0x16c   : > { %v916_v49 = vpop.f32.mrf.mxu3  ;;  %v852_v50 = vadd.f32 %v2828_v27, %v851_v48  ;;  %s2932_s25 = sshll.u32 %s1256_s29, 4  ;;  %s1194_s19 = scalar_lea.sflag [#allocation13], %s2476_s11  ;;  %s1260_s25 = int_to_ptr.hbm [resolvable:$true] %s2932_s25 }
 0x16d   : > { %v1083_v51 = vadd.f32 %v1082_v62, %v1018_v63  ;;  %s1983_s20 = sshra.s32 %s1239_s5, 4  ;;  %s1984_s20 = int_to_ptr.hbm [resolvable:$true] %s1983_s20 }
 0x16e   : > { %v917_v56 = vadd.f32 %v916_v49, %v852_v50  ;;  %s1985_s0 = scalar_lea.hbm %s1984_s20, 128  ;;  %p1990_p9 = scmp.lt.s32.totalorder %s1984_s20, %s3130_s4 }
 0x16f   : > { %1174 = vst [vmem:[%s2841_s12 + $0x10] sm:$0xff] %v1083_v51  ;;  %p1986_p2 = scmp.ne.s32.totalorder %s1984_s20, %s1985_s0  ;;  %p1991_p3 = scmp.lt.s32.totalorder %s1989_s9, %s1985_s0 }
 0x170   : > { %1158 = vst [vmem:[%s2860_s3 + $0x10] sm:$0xff] %v917_v56 }
 0x171   : > { %p1987_p1 = pnand %p1986_p2, %p2418_p13  ;;  %p1992_p5 = por %p1991_p3, %p1990_p9 }
 0x172   : > { %v1020_v57 = vpop.f32.mrf.mxu0  ;;  %v1085_v58 = vpop.f32.mrf.mxu1 }
 0x173   : > { %v1021_v59 = vadd.f32 %v2820_v25, %v1020_v57  ;;  %v854_v14 = vpop.f32.mrf.mxu2  ;;  %p1988_p0 = pneg %p1987_p1 }
 0x174   : > { %v919_v15 = vpop.f32.mrf.mxu3  ;;  %v855_v60 = vadd.f32 %v2828_v27, %v854_v14 }
 0x175   : > { %v1086_v61 = vadd.f32 %v1085_v58, %v1021_v59  ;;  %p1993_p8 = pnand %p1992_p5, %p1988_p0 }
 0x176   : > { %v920_v0 = vadd.f32 %v919_v15, %v855_v60 }
 0x177   : > { %1175 = vst [vmem:[%s2841_s12 + $0x18] sm:$0xff] %v1086_v61 }
 0x178   : > { %1159 = vst [vmem:[%s2860_s3 + $0x18] sm:$0xff] %v920_v0 }
 0x17a   : > { %v1023_v1 = vpop.f32.mrf.mxu0  ;;  %v1088_v4 = vpop.f32.mrf.mxu1 }
 0x17b   : > { %v1024_v5 = vadd.f32 %v2820_v25, %v1023_v1  ;;  %v857_v10 = vpop.f32.mrf.mxu2 }
 0x17c   : > { %v922_v11 = vpop.f32.mrf.mxu3  ;;  %v858_v30 = vadd.f32 %v2828_v27, %v857_v10 }
 0x17d   : > { %v1089_v31 = vadd.f32 %v1088_v4, %v1024_v5 }
 0x17e   : > { %v923_v39 = vadd.f32 %v922_v11, %v858_v30 }
 0x17f   : > { %1176 = vst [vmem:[%s2841_s12 + $0x20] sm:$0xff] %v1089_v31 }
 0x180   : > { %1160 = vst [vmem:[%s2860_s3 + $0x20] sm:$0xff] %v923_v39 }
 0x182   : > { %v1026_v54 = vpop.f32.mrf.mxu0  ;;  %v1091_v55 = vpop.f32.mrf.mxu1 }
 0x183   : > { %v1027_v6 = vadd.f32 %v2820_v25, %v1026_v54  ;;  %v860_v7 = vpop.f32.mrf.mxu2 }
 0x184   : > { %v925_v12 = vpop.f32.mrf.mxu3  ;;  %v861_v13 = vadd.f32 %v2828_v27, %v860_v7 }
 0x185   : > { %v1092_v52 = vadd.f32 %v1091_v55, %v1027_v6 }
 0x186   : > { %v926_v53 = vadd.f32 %v925_v12, %v861_v13 }
 0x187   : > { %1177 = vst [vmem:[%s2841_s12 + $0x28] sm:$0xff] %v1092_v52 }
 0x188   : > { %1161 = vst [vmem:[%s2860_s3 + $0x28] sm:$0xff] %v926_v53 }
 0x18a   : > { %v1029_v16 = vpop.f32.mrf.mxu0  ;;  %v1094_v17 = vpop.f32.mrf.mxu1 }
 0x18b   : > { %v1030_v18 = vadd.f32 %v2820_v25, %v1029_v16  ;;  %v863_v19 = vpop.f32.mrf.mxu2 }
 0x18c   : > { %v928_v20 = vpop.f32.mrf.mxu3  ;;  %v864_v32 = vadd.f32 %v2828_v27, %v863_v19 }
 0x18d   : > { %v1095_v33 = vadd.f32 %v1094_v17, %v1030_v18 }
 0x18e   : > { %v929_v2 = vadd.f32 %v928_v20, %v864_v32 }
 0x18f   : > { %1178 = vst [vmem:[%s2841_s12 + $0x30] sm:$0xff] %v1095_v33 }
 0x190   : > { %1162 = vst [vmem:[%s2860_s3 + $0x30] sm:$0xff] %v929_v2 }
 0x192   : > { %v1032_v3 = vpop.f32.mrf.mxu0  ;;  %v1097_v21 = vpop.f32.mrf.mxu1 }
 0x193   : > { %v1033_v22 = vadd.f32 %v2820_v25, %v1032_v3  ;;  %v866_v23 = vpop.f32.mrf.mxu2 }
 0x194   : > { %v931_v24 = vpop.f32.mrf.mxu3  ;;  %v867_v26 = vadd.f32 %v2828_v27, %v866_v23 }
 0x195   : > { %v1098_v8 = vadd.f32 %v1097_v21, %v1033_v22 }
 0x196   : > { %v932_v9 = vadd.f32 %v931_v24, %v867_v26 }
 0x197   : > { %1179 = vst [vmem:[%s2841_s12 + $0x38] sm:$0xff] %v1098_v8 }
 0x198   : > { %1163 = vst [vmem:[%s2860_s3 + $0x38] sm:$0xff] %v932_v9 }
 0x19a   : > { %v1035_v38 = vpop.f32.mrf.mxu0  ;;  %v1100_v28 = vpop.f32.mrf.mxu1 }
 0x19b   : > { %v1036_v29 = vadd.f32 %v2820_v25, %v1035_v38  ;;  %v869_v34 = vpop.f32.mrf.mxu2 }
 0x19c   : > { %v934_v35 = vpop.f32.mrf.mxu3  ;;  %v870_v46 = vadd.f32 %v2828_v27, %v869_v34 }
 0x19d   : > { %v1101_v47 = vadd.f32 %v1100_v28, %v1036_v29 }
 0x19e   : > { %v935_v36 = vadd.f32 %v934_v35, %v870_v46 }
 0x19f   : > { %1180 = vst [vmem:[%s2841_s12 + $0x40] sm:$0xff] %v1101_v47 }
 0x1a0   : > { %1164 = vst [vmem:[%s2860_s3 + $0x40] sm:$0xff] %v935_v36 }
 0x1a2   : > { %v1038_v37 = vpop.f32.mrf.mxu0  ;;  %v1103_v40 = vpop.f32.mrf.mxu1 }
 0x1a3   : > { %v1039_v41 = vadd.f32 %v2820_v25, %v1038_v37  ;;  %v872_v42 = vpop.f32.mrf.mxu2 }
 0x1a4   : > { %v937_v43 = vpop.f32.mrf.mxu3  ;;  %v873_v44 = vadd.f32 %v2828_v27, %v872_v42 }
 0x1a5   : > { %v1104_v45 = vadd.f32 %v1103_v40, %v1039_v41 }
 0x1a6   : > { %v938_v62 = vadd.f32 %v937_v43, %v873_v44 }
 0x1a7   : > { %1181 = vst [vmem:[%s2841_s12 + $0x48] sm:$0xff] %v1104_v45 }
 0x1a8   : > { %1165 = vst [vmem:[%s2860_s3 + $0x48] sm:$0xff] %v938_v62 }
 0x1aa   : > { %v1041_v63 = vpop.f32.mrf.mxu0  ;;  %v1106_v48 = vpop.f32.mrf.mxu1 }
 0x1ab   : > { %v1042_v49 = vadd.f32 %v2820_v25, %v1041_v63  ;;  %v875_v50 = vpop.f32.mrf.mxu2 }
 0x1ac   : > { %v940_v51 = vpop.f32.mrf.mxu3  ;;  %v876_v56 = vadd.f32 %v2828_v27, %v875_v50 }
 0x1ad   : > { %v1107_v57 = vadd.f32 %v1106_v48, %v1042_v49 }
 0x1ae   : > { %v941_v58 = vadd.f32 %v940_v51, %v876_v56 }
 0x1af   : > { %1182 = vst [vmem:[%s2841_s12 + $0x50] sm:$0xff] %v1107_v57 }
 0x1b0   : > { %1166 = vst [vmem:[%s2860_s3 + $0x50] sm:$0xff] %v941_v58 }
 0x1b2   : > { %v1044_v59 = vpop.f32.mrf.mxu0  ;;  %v1109_v14 = vpop.f32.mrf.mxu1 }
 0x1b3   : > { %v1045_v15 = vadd.f32 %v2820_v25, %v1044_v59  ;;  %v878_v60 = vpop.f32.mrf.mxu2 }
 0x1b4   : > { %v943_v61 = vpop.f32.mrf.mxu3  ;;  %v879_v0 = vadd.f32 %v2828_v27, %v878_v60 }
 0x1b5   : > { %v1110_v1 = vadd.f32 %v1109_v14, %v1045_v15 }
 0x1b6   : > { %v944_v4 = vadd.f32 %v943_v61, %v879_v0 }
 0x1b7   : > { %1183 = vst [vmem:[%s2841_s12 + $0x58] sm:$0xff] %v1110_v1 }
 0x1b8   : > { %1167 = vst [vmem:[%s2860_s3 + $0x58] sm:$0xff] %v944_v4 }
 0x1ba   : > { %v1047_v5 = vpop.f32.mrf.mxu0  ;;  %v1112_v10 = vpop.f32.mrf.mxu1 }
 0x1bb   : > { %v1048_v11 = vadd.f32 %v2820_v25, %v1047_v5  ;;  %v881_v30 = vpop.f32.mrf.mxu2 }
 0x1bc   : > { %v946_v31 = vpop.f32.mrf.mxu3  ;;  %v882_v39 = vadd.f32 %v2828_v27, %v881_v30 }
 0x1bd   : > { %v1113_v54 = vadd.f32 %v1112_v10, %v1048_v11 }
 0x1be   : > { %v947_v55 = vadd.f32 %v946_v31, %v882_v39 }
 0x1bf   : > { %1184 = vst [vmem:[%s2841_s12 + $0x60] sm:$0xff] %v1113_v54 }
 0x1c0   : > { %1168 = vst [vmem:[%s2860_s3 + $0x60] sm:$0xff] %v947_v55 }
 0x1c2   : > { %v1050_v6 = vpop.f32.mrf.mxu0  ;;  %v1115_v7 = vpop.f32.mrf.mxu1 }
 0x1c3   : > { %v1051_v12 = vadd.f32 %v2820_v25, %v1050_v6  ;;  %v884_v13 = vpop.f32.mrf.mxu2 }
 0x1c4   : > { %v949_v52 = vpop.f32.mrf.mxu3  ;;  %v885_v53 = vadd.f32 %v2828_v27, %v884_v13 }
 0x1c5   : > { %v1116_v16 = vadd.f32 %v1115_v7, %v1051_v12 }
 0x1c6   : > { %v950_v17 = vadd.f32 %v949_v52, %v885_v53 }
 0x1c7   : > { %1185 = vst [vmem:[%s2841_s12 + $0x68] sm:$0xff] %v1116_v16 }
 0x1c8   : > { %1169 = vst [vmem:[%s2860_s3 + $0x68] sm:$0xff] %v950_v17 }
 0x1ca   : > { %v1053_v18 = vpop.f32.mrf.mxu0  ;;  %v1118_v19 = vpop.f32.mrf.mxu1 }
 0x1cb   : > { %v1054_v20 = vadd.f32 %v2820_v25, %v1053_v18  ;;  %v887_v32 = vpop.f32.mrf.mxu2 }
 0x1cc   : > { %v952_v33 = vpop.f32.mrf.mxu3  ;;  %v888_v2 = vadd.f32 %v2828_v27, %v887_v32 }
 0x1cd   : > { %v1119_v3 = vadd.f32 %v1118_v19, %v1054_v20 }
 0x1ce   : > { %v953_v21 = vadd.f32 %v952_v33, %v888_v2 }
 0x1cf   : > { %1186 = vst [vmem:[%s2841_s12 + $0x70] sm:$0xff] %v1119_v3 }
 0x1d0   : > { %1170 = vst [vmem:[%s2860_s3 + $0x70] sm:$0xff] %v953_v21 }
 0x1d2   : > { %v1056_v22 = vpop.f32.mrf.mxu0  ;;  %v1121_v23 = vpop.f32.mrf.mxu1 }
 0x1d3   : > { %v1057_v24 = vadd.f32 %v2820_v25, %v1056_v22  ;;  %v890_v26 = vpop.f32.mrf.mxu2 }
 0x1d4   : > { %v955_v8 = vpop.f32.mrf.mxu3  ;;  %v891_v9 = vadd.f32 %v2828_v27, %v890_v26 }
 0x1d5   : > { %v1122_v38 = vadd.f32 %v1121_v23, %v1057_v24 }
 0x1d6   : > { %v956_v28 = vadd.f32 %v955_v8, %v891_v9 }
 0x1d7   : > { %1187 = vst [vmem:[%s2841_s12 + $0x78] sm:$0xff] %v1122_v38 }
 0x1d8   : > { %1171 = vst [vmem:[%s2860_s3 + $0x78] sm:$0xff] %v956_v28 }
 0x1d9   : > { %1996 = shalt.err (!%p1993_p8)
}
 0x1da   : > { %1621 = dma.vmem_to_hbm [thread:$0]  (%p2418_p13), %s1237_s16, 2048, %s1239_s5, %s1194_s19, %s2177_s8, %s2177_s8, %s2178_s2  }
 0x1db   : > { %s2011_s3 = sshra.s32 %s1260_s25, 4  ;;  %s2017_s29 = scalar_lea.hbm %s3131_s26, 1024  ;;  %s2012_s3 = int_to_ptr.hbm [resolvable:$true] %s2011_s3 }
 0x1dc   : > { %s2013_s17 = scalar_lea.hbm %s2012_s3, 128  ;;  %p2018_p10 = scmp.lt.s32.totalorder %s2012_s3, %s3131_s26 }
 0x1dd   : > { %p2014_p11 = scmp.ne.s32.totalorder %s2012_s3, %s2013_s17  ;;  %p2019_p12 = scmp.lt.s32.totalorder %s2017_s29, %s2013_s17 }
 0x1df   : > { %p2015_p4 = pnand %p2014_p11, %p2418_p13  ;;  %p2020_p2 = por %p2019_p12, %p2018_p10 }
 0x1e1   : > { %p2016_p7 = pneg %p2015_p4 }
 0x1e3   : > { %p2021_p1 = pnand %p2020_p2, %p2016_p7 }
 0x1e5   : > { %2024 = shalt.err (!%p2021_p1)
}
 0x1e6   : > { %1622 = dma.vmem_to_hbm [thread:$0]  (%p2418_p13), %s2938_s7, 2048, %s1260_s25, %s1194_s19, %s2177_s8, %s2177_s8, %s2178_s2  }
 0x1e7 PF: > { %p1653_p0 = scmp.ge.s32.totalorder %s2171_s24, 2  ;;  %s1274_s5 = sand.u32 1, %s2111_s30  }
 0x1e8   : > { %s1275_s15 = scalar_lea.sflag [#allocation4], %s1274_s5 }
 0x1e9   : > { %p1643_p9 = pnand %p1653_p0, %p2434_p6 }
 0x1eb   : > { %p1644_p3 = pneg %p1643_p9 }
 0x1ed   : > { %2102 = dma.done.wait (%p1644_p3), %s1275_s15, 2048  }
 0x1ee   : > { %2104 = vsyncadd (%p1644_p3), %s1275_s15, 4294965248  ;;  %s3133_s13 = sadd.s32 4294967294, %s2171_s24  }
 0x1ef   : > { %s1284_s18 = sand.u32 1, %s3133_s13  }
 0x1f0   : > { %s1285_s11 = scalar_lea.sflag [#allocation13], %s1284_s18 }
 0x1f1   : > { %2106 = dma.done.wait (%p1644_p3), %s1285_s11, 4096  }
 0x1f2   : > { %2108 = vsyncadd (%p1644_p3), %s1285_s11, 4294963200  ;;  %s35_s24 = sadd.s32 1, %s2171_s24   ;;  %s3135_s2 = sld [smem:[#allocation20_spill]] }
 0x1f3   : > { %p2984_p13 = scmp.ge.s32.totalorder %s35_s24, 10   ;;  %s3136_s11 = sld [smem:[#allocation37_spill]] }
 0x1f4   : > { %s3137_s12 = sld [smem:[#allocation21_spill]]  ;;  %s3147_s30 = smov %s2115_s10 }
 0x1f5   : > { %s3138_s25 = sld [smem:[#allocation35_spill]]  ;;  %s3149_s13 = smov %s2131_s14 }
 0x1f6   : > { %s3139_s15 = sld [smem:[#allocation22_spill]]  ;;  %s3151_s19 = smov %s2163_s22 }
 0x1f7   : > { %s3140_s16 = sld [smem:[#allocation23_spill]] }
 0x1f8   : > { %s3141_s17 = sld [smem:[#allocation36_spill]]  ;;  %s3148_s10 = smov %s3135_s2 }
 0x1f9   : > { %s3142_s18 = sld [smem:[#allocation27_spill]] }
 0x1fa   : > { %s3143_s20 = sld [smem:[#allocation28_spill]] }
 0x1fb   : > { %s3144_s21 = sld [smem:[#allocation30_spill]]  ;;  %s3150_s14 = smov %s3138_s25 }
 0x1fc   : > { %s3145_s7 = sld [smem:[#allocation31_spill]] }
 0x1fd   : > { %s3146_s23 = sld [smem:[#allocation34_spill]] }
 0x1fe   :  { %34 = sbr.rel (!%p2984_p13) target bundleno = 28 (0x1c), region = 179 }
 0x202   : > { %s3152_s22 = smov %s3145_s7 }
 0x203   :  { %1301 = vsyncpa [#allocation3], 1 }
 0x204   :  { %1303 = vsyncpa [#allocation3 + $0x1], 1 }
 0x205   :  { %1304 = vsyncpa [#allocation6], 1 }
 0x206   :  { %1306 = vsyncpa [#allocation6 + $0x1], 1 }
 0x207   :  { %1307 = vsyncpa [#allocation9], 1 }
 0x208   :  { %1309 = vsyncpa [#allocation9 + $0x1], 1 }
 0x209   :  { %1310 = vsyncpa [#allocation4], 1 }
 0x20a   :  { %1312 = vsyncpa [#allocation4 + $0x1], 1 }
 0x20b   :  { %1313 = vsyncpa [#allocation13], 1 }
 0x20c   :  { %1315 = vsyncpa [#allocation13 + $0x1], 1 }

</bundles_post_ra>
